<compile_context>
chip_gen: v5e
topology: v5e:2x2
jax: 0.10.0
libtpu: 0.0.40
codegen_flags: <defaults>
</compile_context>

<pallas_src>
import functools

import jax
import jax.numpy as jnp
from jax import lax
from jax.experimental import pallas as pl
from jax.experimental.pallas import tpu as pltpu


def gru_fc_kernel(x_ref, w_i_ref, w_h_ref, b_i_ref, b_hn_ref, fc_w_ref, fc_b_ref,
                  out_ref, xw_ref, *, S, B, H):
    """Whole forward in one invocation.

    x_ref   : (S*B, D)   time-major, batch-padded input
    w_i_ref : (D, 3H)    fused input-projection weights (r | z | n), lane-padded per gate
    w_h_ref : (H, 3H)    fused hidden-projection weights
    b_i_ref : (1, 3H)    fused biases: (b_ir+b_hr | b_iz+b_hz | b_in)
    b_hn_ref: (1, H)     hidden bias of the n gate (stays inside r * (...))
    fc_w_ref: (H, PO)    FC head weight (lane-padded output dim)
    fc_b_ref: (1, PO)
    out_ref : (B, PO)
    xw_ref  : (S*B, 3H)  VMEM scratch holding the hoisted input projections
    """
    # (1) Hoisted input projections: one big GEMM outside the serial recurrence.
    xw_ref[...] = (
        jnp.dot(x_ref[...], w_i_ref[...], preferred_element_type=jnp.float32)
        + b_i_ref[...])

    w_h = w_h_ref[...]
    b_hn = b_hn_ref[...]

    def step(t, h):
        row = pl.multiple_of(t * B, B)                 # B is a multiple of 8 (sublane aligned)
        xw_t = xw_ref[pl.ds(row, B), :]                # (B, 3H) precomputed x-projection
        hw = jnp.dot(h.astype(w_h.dtype), w_h,
                     preferred_element_type=jnp.float32)   # (B, 3H) single recurrent matmul
        # Gate slices are 128-lane aligned because H is padded to a multiple of 128.
        r = jax.nn.sigmoid(xw_t[:, :H] + hw[:, :H])
        z = jax.nn.sigmoid(xw_t[:, H:2 * H] + hw[:, H:2 * H])
        n = jnp.tanh(xw_t[:, 2 * H:] + r * (hw[:, 2 * H:] + b_hn))
        return n + z * (h - n)                          # == (1 - z) * n + z * h

    hn = lax.fori_loop(0, S, step, jnp.zeros((B, H), jnp.float32), unroll=True)

    # Fused head: out = Sigmoid(hn) @ W_fc + b_fc  (lane-dense padded output block).
    hn_sig = jax.nn.sigmoid(hn)
    out_ref[...] = (
        jnp.dot(hn_sig.astype(fc_w_ref.dtype), fc_w_ref[...],
                preferred_element_type=jnp.float32)
        + fc_b_ref[...])


def gru_model_forward(x, params, pred_len, output_dim, weight_dtype=jnp.float32):
    """Pallas equivalent of GRUModel.forward (layer_dim == 1, inference)."""
    B, S, D = x.shape
    H = params["w_hr"].shape[0]
    PO = pred_len * output_dim

    SUB, LANE = 8, 128
    B_pad = ((B + SUB - 1) // SUB) * SUB
    H_pad = ((H + LANE - 1) // LANE) * LANE
    PO_pad = ((PO + LANE - 1) // LANE) * LANE

    def pad2(a, rows, cols):
        return jnp.pad(a, ((0, rows - a.shape[0]), (0, cols - a.shape[1])))

    # Fused + zero-padded parameters (padding contributes exactly zero to real outputs).
    w_i = jnp.concatenate(
        [pad2(params["w_ir"], D, H_pad),
         pad2(params["w_iz"], D, H_pad),
         pad2(params["w_in"], D, H_pad)], axis=1).astype(weight_dtype)       # (D, 3H_pad)
    w_h = jnp.concatenate(
        [pad2(params["w_hr"], H_pad, H_pad),
         pad2(params["w_hz"], H_pad, H_pad),
         pad2(params["w_hn"], H_pad, H_pad)], axis=1).astype(weight_dtype)   # (H_pad, 3H_pad)
    b_i = jnp.concatenate(
        [pad2(params["b_r"], 1, H_pad),
         pad2(params["b_z"], 1, H_pad),
         pad2(params["b_in"], 1, H_pad)], axis=1).astype(jnp.float32)        # (1, 3H_pad)
    b_hn = pad2(params["b_hn"], 1, H_pad).astype(jnp.float32)                # (1, H_pad)
    fc_w = pad2(params["fc_w"], H_pad, PO_pad).astype(weight_dtype)          # (H_pad, PO_pad)
    fc_b = pad2(params["fc_b"], 1, PO_pad).astype(jnp.float32)               # (1, PO_pad)

    # Time-major, batch-padded, flattened input: row t*B_pad + b == x[b, t, :].
    x_f = x.astype(jnp.float32)
    x_pad = jnp.pad(x_f, ((0, B_pad - B), (0, 0), (0, 0)))                   # (B_pad, S, D)
    x_tm = jnp.transpose(x_pad, (1, 0, 2)).reshape(S * B_pad, D).astype(weight_dtype)

    kernel = functools.partial(gru_fc_kernel, S=S, B=B_pad, H=H_pad)

    def full_spec(shape):
        return pl.BlockSpec(shape, lambda i: tuple(0 for _ in shape))

    # Everything fits in VMEM at once; a single grid step keeps weights resident and avoids
    # per-timestep grid / pipelining overhead.
    # TODO(synk): for very long S or large H, chunk the time axis with a BlockSpec and set
    # pltpu.CompilerParams(vmem_limit_bytes=...) (notably on v7x's 64 MiB VMEM).
    out = pl.pallas_call(
        kernel,
        out_shape=jax.ShapeDtypeStruct((B_pad, PO_pad), jnp.float32),
        grid_spec=pltpu.PrefetchScalarGridSpec(
            num_scalar_prefetch=0,
            grid=(1,),
            in_specs=[
                full_spec((S * B_pad, D)),
                full_spec((D, 3 * H_pad)),
                full_spec((H_pad, 3 * H_pad)),
                full_spec((1, 3 * H_pad)),
                full_spec((1, H_pad)),
                full_spec((H_pad, PO_pad)),
                full_spec((1, PO_pad)),
            ],
            out_specs=full_spec((B_pad, PO_pad)),
            scratch_shapes=[pltpu.VMEM((S * B_pad, 3 * H_pad), jnp.float32)],
        ),
        compiler_params=pltpu.CompilerParams(
            dimension_semantics=("arbitrary",)),
    )(x_tm, w_i, w_h, b_i, b_hn, fc_w, fc_b)

    # PyTorch: out.view(-1, pred_len, output_dim); with layer_dim=1 -> (B, P, O)
    return out[:B, :PO].reshape(-1, pred_len, output_dim)


def gru_model_reference(x, params, pred_len, output_dim):
    """Pure-JAX reference (mirrors torch.nn.GRU + Linear + Sigmoid)."""
    x = x.astype(jnp.float32)
    B, S, D = x.shape
    H = params["w_hr"].shape[0]
    h0 = jnp.zeros((B, H), jnp.float32)

    def step(h, x_t):
        r = jax.nn.sigmoid(x_t @ params["w_ir"] + h @ params["w_hr"] + params["b_r"])
        z = jax.nn.sigmoid(x_t @ params["w_iz"] + h @ params["w_hz"] + params["b_z"])
        n = jnp.tanh(x_t @ params["w_in"] + params["b_in"]
                     + r * (h @ params["w_hn"] + params["b_hn"]))
        h_new = (1.0 - z) * n + z * h
        return h_new, None

    hn, _ = lax.scan(step, h0, jnp.transpose(x, (1, 0, 2)))
    out = jax.nn.sigmoid(hn) @ params["fc_w"] + params["fc_b"]
    return out.reshape(-1, pred_len, output_dim)


def init_params(key, input_dim, hidden_dim, pred_len, output_dim):
    """Deterministic init matching PyTorch shapes (uniform +/- 1/sqrt(H))."""
    H, D, PO = hidden_dim, input_dim, pred_len * output_dim
    k = 1.0 / jnp.sqrt(jnp.float32(H))
    keys = jax.random.split(key, 12)
    u = lambda kk, shape: jax.random.uniform(kk, shape, jnp.float32, -k, k)

    # nn.GRU stores weight_ih_l0 (3H, D); we keep per-gate transposed (D, H).
    p = {
        "w_ir": u(keys[0], (D, H)), "w_iz": u(keys[1], (D, H)), "w_in": u(keys[2], (D, H)),
        "w_hr": u(keys[3], (H, H)), "w_hz": u(keys[4], (H, H)), "w_hn": u(keys[5], (H, H)),
        # b_r = b_ir + b_hr, b_z = b_iz + b_hz; b_in / b_hn stay separate (r gates b_hn)
        "b_r": u(keys[6], (1, H)) + u(keys[7], (1, H)),
        "b_z": u(keys[8], (1, H)) + u(keys[9], (1, H)),
        "b_in": u(keys[10], (1, H)),
        "b_hn": u(keys[11], (1, H)),
    }
    kf = 1.0 / jnp.sqrt(jnp.float32(H))
    kw, kb = jax.random.split(jax.random.fold_in(key, 99))
    p["fc_w"] = jax.random.uniform(kw, (H, PO), jnp.float32, -kf, kf)
    p["fc_b"] = jax.random.uniform(kb, (1, PO), jnp.float32, -kf, kf)
    return p


if __name__ == "__main__":
    # Small config: layer_dim = 1 (single hidden layer, matching module name).
    batch, seq, input_dim = 2, 8, 4
    hidden_dim, pred_len, output_dim = 32, 4, 2
    # TODO(synk): dropout_prob is inert for layer_dim=1 (and inference); not modeled.

    key = jax.random.PRNGKey(0)
    pkey, xkey = jax.random.split(key)
    params = init_params(pkey, input_dim, hidden_dim, pred_len, output_dim)
    x = jax.random.normal(xkey, (batch, seq, input_dim), jnp.float32)

    # weight_dtype=jnp.bfloat16 is the v6e/v7x option (f32 accumulation is kept in-kernel);
    # the demo runs f32 so the result matches the f32 reference to 1e-5.
    out = gru_model_forward(x, params, pred_len, output_dim, weight_dtype=jnp.float32)
    out = jax.block_until_ready(out)

    ref = gru_model_reference(x, params, pred_len, output_dim)
    assert out.shape == (batch, pred_len, output_dim)
    assert jnp.allclose(out, ref, atol=1e-5, rtol=1e-5)

    print("KERNEL_OK")
</pallas_src>

<mosaic_0001>
module attributes {stable_mosaic.version = 11 : i64} {
  func.func @gru_fc_kernel(%arg0: i32, %arg1: memref<64x4xf32, #tpu.memory_space<vmem>>, %arg2: memref<4x384xf32, #tpu.memory_space<vmem>>, %arg3: memref<128x384xf32, #tpu.memory_space<vmem>>, %arg4: memref<1x384xf32, #tpu.memory_space<vmem>>, %arg5: memref<1x128xf32, #tpu.memory_space<vmem>>, %arg6: memref<128x128xf32, #tpu.memory_space<vmem>>, %arg7: memref<1x128xf32, #tpu.memory_space<vmem>>, %arg8: memref<8x128xf32, #tpu.memory_space<vmem>>, %arg9: memref<64x384xf32, #tpu.memory_space<vmem>>) attributes {dimension_semantics = [#tpu.dimension_semantics<arbitrary>], iteration_bounds = array<i64: 1>, scalar_prefetch = 0 : i64, scratch_operands = 1 : i64, tpu.core_type = #tpu.core_type<tc>, window_params = [{pipeline_mode = #tpu.pipeline_mode<synchronous>, transform_indices = @transform_0, window_bounds = array<i64: 64, 4>}, {pipeline_mode = #tpu.pipeline_mode<synchronous>, transform_indices = @transform_1, window_bounds = array<i64: 4, 384>}, {pipeline_mode = #tpu.pipeline_mode<synchronous>, transform_indices = @transform_2, window_bounds = array<i64: 128, 384>}, {pipeline_mode = #tpu.pipeline_mode<synchronous>, transform_indices = @transform_3, window_bounds = array<i64: 1, 384>}, {pipeline_mode = #tpu.pipeline_mode<synchronous>, transform_indices = @transform_4, window_bounds = array<i64: 1, 128>}, {pipeline_mode = #tpu.pipeline_mode<synchronous>, transform_indices = @transform_5, window_bounds = array<i64: 128, 128>}, {pipeline_mode = #tpu.pipeline_mode<synchronous>, transform_indices = @transform_6, window_bounds = array<i64: 1, 128>}, {pipeline_mode = #tpu.pipeline_mode<synchronous>, transform_indices = @transform_7, window_bounds = array<i64: 8, 128>}]} {
    %c0 = arith.constant 0 : index
    %c0_0 = arith.constant 0 : index
    %0 = vector.load %arg1[%c0, %c0_0] : memref<64x4xf32, #tpu.memory_space<vmem>>, vector<64x4xf32>
    %c0_1 = arith.constant 0 : index
    %c0_2 = arith.constant 0 : index
    %1 = vector.load %arg2[%c0_1, %c0_2] : memref<4x384xf32, #tpu.memory_space<vmem>>, vector<4x384xf32>
    %cst = arith.constant dense<0.000000e+00> : vector<64x384xf32>
    %2 = tpu.matmul %0, %1, %cst {dimension_numbers = #tpu.dot_dimension_numbers<[1], [0], [0], [1], [0, 0, 1, 1], [], []>} : vector<64x4xf32>, vector<4x384xf32>, vector<64x384xf32> -> vector<64x384xf32>
    %c0_3 = arith.constant 0 : index
    %c0_4 = arith.constant 0 : index
    %3 = vector.load %arg4[%c0_3, %c0_4] : memref<1x384xf32, #tpu.memory_space<vmem>>, vector<1x384xf32>
    %4 = vector.broadcast %3 : vector<1x384xf32> to vector<64x384xf32>
    %5 = arith.addf %2, %4 : vector<64x384xf32>
    %c0_5 = arith.constant 0 : index
    %c0_6 = arith.constant 0 : index
    %6 = vector.load %arg9[%c0_5, %c0_6] : memref<64x384xf32, #tpu.memory_space<vmem>>, vector<64x384xf32>
    tpu.vector_store %arg9[%c0_5, %c0_6], %5 {strides = array<i32>} : memref<64x384xf32, #tpu.memory_space<vmem>>, vector<64x384xf32>,
    %c0_7 = arith.constant 0 : index
    %c0_8 = arith.constant 0 : index
    %7 = vector.load %arg3[%c0_7, %c0_8] : memref<128x384xf32, #tpu.memory_space<vmem>>, vector<128x384xf32>
    %c0_9 = arith.constant 0 : index
    %c0_10 = arith.constant 0 : index
    %8 = vector.load %arg5[%c0_9, %c0_10] : memref<1x128xf32, #tpu.memory_space<vmem>>, vector<1x128xf32>
    %cst_11 = arith.constant 0.000000e+00 : f32
    %9 = vector.broadcast %cst_11 : f32 to vector<8x128xf32>
    %c0_i32 = arith.constant 0 : i32
    %c8_i32 = arith.constant 8 : i32
    %10 = arith.muli %c0_i32, %c8_i32 : i32
    %11 = tpu.assume_multiple %10, 8 : i32
    %12 = arith.index_cast %11 : i32 to index
    %c0_12 = arith.constant 0 : index
    %13 = vector.load %arg9[%12, %c0_12] : memref<64x384xf32, #tpu.memory_space<vmem>>, vector<8x384xf32>
    %cst_13 = arith.constant dense<0.000000e+00> : vector<8x384xf32>
    %14 = tpu.matmul %9, %7, %cst_13 {dimension_numbers = #tpu.dot_dimension_numbers<[1], [0], [0], [1], [0, 0, 1, 1], [], []>} : vector<8x128xf32>, vector<128x384xf32>, vector<8x384xf32> -> vector<8x384xf32>
    %15 = vector.extract_strided_slice %13 {offsets = [0, 0], sizes = [8, 128], strides = [1, 1]} : vector<8x384xf32> to vector<8x128xf32>
    %16 = vector.extract_strided_slice %14 {offsets = [0, 0], sizes = [8, 128], strides = [1, 1]} : vector<8x384xf32> to vector<8x128xf32>
    %17 = arith.addf %15, %16 : vector<8x128xf32>
    %18 = arith.negf %17 : vector<8x128xf32>
    %19 = math.exp %18 : vector<8x128xf32>
    %cst_14 = arith.constant 1.000000e+00 : f32
    %20 = vector.broadcast %cst_14 : f32 to vector<8x128xf32>
    %21 = arith.addf %20, %19 : vector<8x128xf32>
    %22 = arith.divf %20, %21 : vector<8x128xf32>
    %23 = vector.extract_strided_slice %13 {offsets = [0, 128], sizes = [8, 128], strides = [1, 1]} : vector<8x384xf32> to vector<8x128xf32>
    %24 = vector.extract_strided_slice %14 {offsets = [0, 128], sizes = [8, 128], strides = [1, 1]} : vector<8x384xf32> to vector<8x128xf32>
    %25 = arith.addf %23, %24 : vector<8x128xf32>
    %26 = arith.negf %25 : vector<8x128xf32>
    %27 = math.exp %26 : vector<8x128xf32>
    %cst_15 = arith.constant 1.000000e+00 : f32
    %28 = vector.broadcast %cst_15 : f32 to vector<8x128xf32>
    %29 = arith.addf %28, %27 : vector<8x128xf32>
    %30 = arith.divf %28, %29 : vector<8x128xf32>
    %31 = vector.extract_strided_slice %13 {offsets = [0, 256], sizes = [8, 128], strides = [1, 1]} : vector<8x384xf32> to vector<8x128xf32>
    %32 = vector.extract_strided_slice %14 {offsets = [0, 256], sizes = [8, 128], strides = [1, 1]} : vector<8x384xf32> to vector<8x128xf32>
    %33 = vector.broadcast %8 : vector<1x128xf32> to vector<8x128xf32>
    %34 = arith.addf %32, %33 : vector<8x128xf32>
    %35 = arith.mulf %22, %34 : vector<8x128xf32>
    %36 = arith.addf %31, %35 : vector<8x128xf32>
    %37 = math.tanh %36 : vector<8x128xf32>
    %38 = arith.subf %9, %37 : vector<8x128xf32>
    %39 = arith.mulf %30, %38 : vector<8x128xf32>
    %40 = arith.addf %37, %39 : vector<8x128xf32>
    %c1_i32 = arith.constant 1 : i32
    %c8_i32_16 = arith.constant 8 : i32
    %41 = arith.muli %c1_i32, %c8_i32_16 : i32
    %42 = tpu.assume_multiple %41, 8 : i32
    %43 = arith.index_cast %42 : i32 to index
    %c0_17 = arith.constant 0 : index
    %44 = vector.load %arg9[%43, %c0_17] : memref<64x384xf32, #tpu.memory_space<vmem>>, vector<8x384xf32>
    %cst_18 = arith.constant dense<0.000000e+00> : vector<8x384xf32>
    %45 = tpu.matmul %40, %7, %cst_18 {dimension_numbers = #tpu.dot_dimension_numbers<[1], [0], [0], [1], [0, 0, 1, 1], [], []>} : vector<8x128xf32>, vector<128x384xf32>, vector<8x384xf32> -> vector<8x384xf32>
    %46 = vector.extract_strided_slice %44 {offsets = [0, 0], sizes = [8, 128], strides = [1, 1]} : vector<8x384xf32> to vector<8x128xf32>
    %47 = vector.extract_strided_slice %45 {offsets = [0, 0], sizes = [8, 128], strides = [1, 1]} : vector<8x384xf32> to vector<8x128xf32>
    %48 = arith.addf %46, %47 : vector<8x128xf32>
    %49 = arith.negf %48 : vector<8x128xf32>
    %50 = math.exp %49 : vector<8x128xf32>
    %cst_19 = arith.constant 1.000000e+00 : f32
    %51 = vector.broadcast %cst_19 : f32 to vector<8x128xf32>
    %52 = arith.addf %51, %50 : vector<8x128xf32>
    %53 = arith.divf %51, %52 : vector<8x128xf32>
    %54 = vector.extract_strided_slice %44 {offsets = [0, 128], sizes = [8, 128], strides = [1, 1]} : vector<8x384xf32> to vector<8x128xf32>
    %55 = vector.extract_strided_slice %45 {offsets = [0, 128], sizes = [8, 128], strides = [1, 1]} : vector<8x384xf32> to vector<8x128xf32>
    %56 = arith.addf %54, %55 : vector<8x128xf32>
    %57 = arith.negf %56 : vector<8x128xf32>
    %58 = math.exp %57 : vector<8x128xf32>
    %cst_20 = arith.constant 1.000000e+00 : f32
    %59 = vector.broadcast %cst_20 : f32 to vector<8x128xf32>
    %60 = arith.addf %59, %58 : vector<8x128xf32>
    %61 = arith.divf %59, %60 : vector<8x128xf32>
    %62 = vector.extract_strided_slice %44 {offsets = [0, 256], sizes = [8, 128], strides = [1, 1]} : vector<8x384xf32> to vector<8x128xf32>
    %63 = vector.extract_strided_slice %45 {offsets = [0, 256], sizes = [8, 128], strides = [1, 1]} : vector<8x384xf32> to vector<8x128xf32>
    %64 = vector.broadcast %8 : vector<1x128xf32> to vector<8x128xf32>
    %65 = arith.addf %63, %64 : vector<8x128xf32>
    %66 = arith.mulf %53, %65 : vector<8x128xf32>
    %67 = arith.addf %62, %66 : vector<8x128xf32>
    %68 = math.tanh %67 : vector<8x128xf32>
    %69 = arith.subf %40, %68 : vector<8x128xf32>
    %70 = arith.mulf %61, %69 : vector<8x128xf32>
    %71 = arith.addf %68, %70 : vector<8x128xf32>
    %c2_i32 = arith.constant 2 : i32
    %c8_i32_21 = arith.constant 8 : i32
    %72 = arith.muli %c2_i32, %c8_i32_21 : i32
    %73 = tpu.assume_multiple %72, 8 : i32
    %74 = arith.index_cast %73 : i32 to index
    %c0_22 = arith.constant 0 : index
    %75 = vector.load %arg9[%74, %c0_22] : memref<64x384xf32, #tpu.memory_space<vmem>>, vector<8x384xf32>
    %cst_23 = arith.constant dense<0.000000e+00> : vector<8x384xf32>
    %76 = tpu.matmul %71, %7, %cst_23 {dimension_numbers = #tpu.dot_dimension_numbers<[1], [0], [0], [1], [0, 0, 1, 1], [], []>} : vector<8x128xf32>, vector<128x384xf32>, vector<8x384xf32> -> vector<8x384xf32>
    %77 = vector.extract_strided_slice %75 {offsets = [0, 0], sizes = [8, 128], strides = [1, 1]} : vector<8x384xf32> to vector<8x128xf32>
    %78 = vector.extract_strided_slice %76 {offsets = [0, 0], sizes = [8, 128], strides = [1, 1]} : vector<8x384xf32> to vector<8x128xf32>
    %79 = arith.addf %77, %78 : vector<8x128xf32>
    %80 = arith.negf %79 : vector<8x128xf32>
    %81 = math.exp %80 : vector<8x128xf32>
    %cst_24 = arith.constant 1.000000e+00 : f32
    %82 = vector.broadcast %cst_24 : f32 to vector<8x128xf32>
    %83 = arith.addf %82, %81 : vector<8x128xf32>
    %84 = arith.divf %82, %83 : vector<8x128xf32>
    %85 = vector.extract_strided_slice %75 {offsets = [0, 128], sizes = [8, 128], strides = [1, 1]} : vector<8x384xf32> to vector<8x128xf32>
    %86 = vector.extract_strided_slice %76 {offsets = [0, 128], sizes = [8, 128], strides = [1, 1]} : vector<8x384xf32> to vector<8x128xf32>
    %87 = arith.addf %85, %86 : vector<8x128xf32>
    %88 = arith.negf %87 : vector<8x128xf32>
    %89 = math.exp %88 : vector<8x128xf32>
    %cst_25 = arith.constant 1.000000e+00 : f32
    %90 = vector.broadcast %cst_25 : f32 to vector<8x128xf32>
    %91 = arith.addf %90, %89 : vector<8x128xf32>
    %92 = arith.divf %90, %91 : vector<8x128xf32>
    %93 = vector.extract_strided_slice %75 {offsets = [0, 256], sizes = [8, 128], strides = [1, 1]} : vector<8x384xf32> to vector<8x128xf32>
    %94 = vector.extract_strided_slice %76 {offsets = [0, 256], sizes = [8, 128], strides = [1, 1]} : vector<8x384xf32> to vector<8x128xf32>
    %95 = vector.broadcast %8 : vector<1x128xf32> to vector<8x128xf32>
    %96 = arith.addf %94, %95 : vector<8x128xf32>
    %97 = arith.mulf %84, %96 : vector<8x128xf32>
    %98 = arith.addf %93, %97 : vector<8x128xf32>
    %99 = math.tanh %98 : vector<8x128xf32>
    %100 = arith.subf %71, %99 : vector<8x128xf32>
    %101 = arith.mulf %92, %100 : vector<8x128xf32>
    %102 = arith.addf %99, %101 : vector<8x128xf32>
    %c3_i32 = arith.constant 3 : i32
    %c8_i32_26 = arith.constant 8 : i32
    %103 = arith.muli %c3_i32, %c8_i32_26 : i32
    %104 = tpu.assume_multiple %103, 8 : i32
    %105 = arith.index_cast %104 : i32 to index
    %c0_27 = arith.constant 0 : index
    %106 = vector.load %arg9[%105, %c0_27] : memref<64x384xf32, #tpu.memory_space<vmem>>, vector<8x384xf32>
    %cst_28 = arith.constant dense<0.000000e+00> : vector<8x384xf32>
    %107 = tpu.matmul %102, %7, %cst_28 {dimension_numbers = #tpu.dot_dimension_numbers<[1], [0], [0], [1], [0, 0, 1, 1], [], []>} : vector<8x128xf32>, vector<128x384xf32>, vector<8x384xf32> -> vector<8x384xf32>
    %108 = vector.extract_strided_slice %106 {offsets = [0, 0], sizes = [8, 128], strides = [1, 1]} : vector<8x384xf32> to vector<8x128xf32>
    %109 = vector.extract_strided_slice %107 {offsets = [0, 0], sizes = [8, 128], strides = [1, 1]} : vector<8x384xf32> to vector<8x128xf32>
    %110 = arith.addf %108, %109 : vector<8x128xf32>
    %111 = arith.negf %110 : vector<8x128xf32>
    %112 = math.exp %111 : vector<8x128xf32>
    %cst_29 = arith.constant 1.000000e+00 : f32
    %113 = vector.broadcast %cst_29 : f32 to vector<8x128xf32>
    %114 = arith.addf %113, %112 : vector<8x128xf32>
    %115 = arith.divf %113, %114 : vector<8x128xf32>
    %116 = vector.extract_strided_slice %106 {offsets = [0, 128], sizes = [8, 128], strides = [1, 1]} : vector<8x384xf32> to vector<8x128xf32>
    %117 = vector.extract_strided_slice %107 {offsets = [0, 128], sizes = [8, 128], strides = [1, 1]} : vector<8x384xf32> to vector<8x128xf32>
    %118 = arith.addf %116, %117 : vector<8x128xf32>
    %119 = arith.negf %118 : vector<8x128xf32>
    %120 = math.exp %119 : vector<8x128xf32>
    %cst_30 = arith.constant 1.000000e+00 : f32
    %121 = vector.broadcast %cst_30 : f32 to vector<8x128xf32>
    %122 = arith.addf %121, %120 : vector<8x128xf32>
    %123 = arith.divf %121, %122 : vector<8x128xf32>
    %124 = vector.extract_strided_slice %106 {offsets = [0, 256], sizes = [8, 128], strides = [1, 1]} : vector<8x384xf32> to vector<8x128xf32>
    %125 = vector.extract_strided_slice %107 {offsets = [0, 256], sizes = [8, 128], strides = [1, 1]} : vector<8x384xf32> to vector<8x128xf32>
    %126 = vector.broadcast %8 : vector<1x128xf32> to vector<8x128xf32>
    %127 = arith.addf %125, %126 : vector<8x128xf32>
    %128 = arith.mulf %115, %127 : vector<8x128xf32>
    %129 = arith.addf %124, %128 : vector<8x128xf32>
    %130 = math.tanh %129 : vector<8x128xf32>
    %131 = arith.subf %102, %130 : vector<8x128xf32>
    %132 = arith.mulf %123, %131 : vector<8x128xf32>
    %133 = arith.addf %130, %132 : vector<8x128xf32>
    %c4_i32 = arith.constant 4 : i32
    %c8_i32_31 = arith.constant 8 : i32
    %134 = arith.muli %c4_i32, %c8_i32_31 : i32
    %135 = tpu.assume_multiple %134, 8 : i32
    %136 = arith.index_cast %135 : i32 to index
    %c0_32 = arith.constant 0 : index
    %137 = vector.load %arg9[%136, %c0_32] : memref<64x384xf32, #tpu.memory_space<vmem>>, vector<8x384xf32>
    %cst_33 = arith.constant dense<0.000000e+00> : vector<8x384xf32>
    %138 = tpu.matmul %133, %7, %cst_33 {dimension_numbers = #tpu.dot_dimension_numbers<[1], [0], [0], [1], [0, 0, 1, 1], [], []>} : vector<8x128xf32>, vector<128x384xf32>, vector<8x384xf32> -> vector<8x384xf32>
    %139 = vector.extract_strided_slice %137 {offsets = [0, 0], sizes = [8, 128], strides = [1, 1]} : vector<8x384xf32> to vector<8x128xf32>
    %140 = vector.extract_strided_slice %138 {offsets = [0, 0], sizes = [8, 128], strides = [1, 1]} : vector<8x384xf32> to vector<8x128xf32>
    %141 = arith.addf %139, %140 : vector<8x128xf32>
    %142 = arith.negf %141 : vector<8x128xf32>
    %143 = math.exp %142 : vector<8x128xf32>
    %cst_34 = arith.constant 1.000000e+00 : f32
    %144 = vector.broadcast %cst_34 : f32 to vector<8x128xf32>
    %145 = arith.addf %144, %143 : vector<8x128xf32>
    %146 = arith.divf %144, %145 : vector<8x128xf32>
    %147 = vector.extract_strided_slice %137 {offsets = [0, 128], sizes = [8, 128], strides = [1, 1]} : vector<8x384xf32> to vector<8x128xf32>
    %148 = vector.extract_strided_slice %138 {offsets = [0, 128], sizes = [8, 128], strides = [1, 1]} : vector<8x384xf32> to vector<8x128xf32>
    %149 = arith.addf %147, %148 : vector<8x128xf32>
    %150 = arith.negf %149 : vector<8x128xf32>
    %151 = math.exp %150 : vector<8x128xf32>
    %cst_35 = arith.constant 1.000000e+00 : f32
    %152 = vector.broadcast %cst_35 : f32 to vector<8x128xf32>
    %153 = arith.addf %152, %151 : vector<8x128xf32>
    %154 = arith.divf %152, %153 : vector<8x128xf32>
    %155 = vector.extract_strided_slice %137 {offsets = [0, 256], sizes = [8, 128], strides = [1, 1]} : vector<8x384xf32> to vector<8x128xf32>
    %156 = vector.extract_strided_slice %138 {offsets = [0, 256], sizes = [8, 128], strides = [1, 1]} : vector<8x384xf32> to vector<8x128xf32>
    %157 = vector.broadcast %8 : vector<1x128xf32> to vector<8x128xf32>
    %158 = arith.addf %156, %157 : vector<8x128xf32>
    %159 = arith.mulf %146, %158 : vector<8x128xf32>
    %160 = arith.addf %155, %159 : vector<8x128xf32>
    %161 = math.tanh %160 : vector<8x128xf32>
    %162 = arith.subf %133, %161 : vector<8x128xf32>
    %163 = arith.mulf %154, %162 : vector<8x128xf32>
    %164 = arith.addf %161, %163 : vector<8x128xf32>
    %c5_i32 = arith.constant 5 : i32
    %c8_i32_36 = arith.constant 8 : i32
    %165 = arith.muli %c5_i32, %c8_i32_36 : i32
    %166 = tpu.assume_multiple %165, 8 : i32
    %167 = arith.index_cast %166 : i32 to index
    %c0_37 = arith.constant 0 : index
    %168 = vector.load %arg9[%167, %c0_37] : memref<64x384xf32, #tpu.memory_space<vmem>>, vector<8x384xf32>
    %cst_38 = arith.constant dense<0.000000e+00> : vector<8x384xf32>
    %169 = tpu.matmul %164, %7, %cst_38 {dimension_numbers = #tpu.dot_dimension_numbers<[1], [0], [0], [1], [0, 0, 1, 1], [], []>} : vector<8x128xf32>, vector<128x384xf32>, vector<8x384xf32> -> vector<8x384xf32>
    %170 = vector.extract_strided_slice %168 {offsets = [0, 0], sizes = [8, 128], strides = [1, 1]} : vector<8x384xf32> to vector<8x128xf32>
    %171 = vector.extract_strided_slice %169 {offsets = [0, 0], sizes = [8, 128], strides = [1, 1]} : vector<8x384xf32> to vector<8x128xf32>
    %172 = arith.addf %170, %171 : vector<8x128xf32>
    %173 = arith.negf %172 : vector<8x128xf32>
    %174 = math.exp %173 : vector<8x128xf32>
    %cst_39 = arith.constant 1.000000e+00 : f32
    %175 = vector.broadcast %cst_39 : f32 to vector<8x128xf32>
    %176 = arith.addf %175, %174 : vector<8x128xf32>
    %177 = arith.divf %175, %176 : vector<8x128xf32>
    %178 = vector.extract_strided_slice %168 {offsets = [0, 128], sizes = [8, 128], strides = [1, 1]} : vector<8x384xf32> to vector<8x128xf32>
    %179 = vector.extract_strided_slice %169 {offsets = [0, 128], sizes = [8, 128], strides = [1, 1]} : vector<8x384xf32> to vector<8x128xf32>
    %180 = arith.addf %178, %179 : vector<8x128xf32>
    %181 = arith.negf %180 : vector<8x128xf32>
    %182 = math.exp %181 : vector<8x128xf32>
    %cst_40 = arith.constant 1.000000e+00 : f32
    %183 = vector.broadcast %cst_40 : f32 to vector<8x128xf32>
    %184 = arith.addf %183, %182 : vector<8x128xf32>
    %185 = arith.divf %183, %184 : vector<8x128xf32>
    %186 = vector.extract_strided_slice %168 {offsets = [0, 256], sizes = [8, 128], strides = [1, 1]} : vector<8x384xf32> to vector<8x128xf32>
    %187 = vector.extract_strided_slice %169 {offsets = [0, 256], sizes = [8, 128], strides = [1, 1]} : vector<8x384xf32> to vector<8x128xf32>
    %188 = vector.broadcast %8 : vector<1x128xf32> to vector<8x128xf32>
    %189 = arith.addf %187, %188 : vector<8x128xf32>
    %190 = arith.mulf %177, %189 : vector<8x128xf32>
    %191 = arith.addf %186, %190 : vector<8x128xf32>
    %192 = math.tanh %191 : vector<8x128xf32>
    %193 = arith.subf %164, %192 : vector<8x128xf32>
    %194 = arith.mulf %185, %193 : vector<8x128xf32>
    %195 = arith.addf %192, %194 : vector<8x128xf32>
    %c6_i32 = arith.constant 6 : i32
    %c8_i32_41 = arith.constant 8 : i32
    %196 = arith.muli %c6_i32, %c8_i32_41 : i32
    %197 = tpu.assume_multiple %196, 8 : i32
    %198 = arith.index_cast %197 : i32 to index
    %c0_42 = arith.constant 0 : index
    %199 = vector.load %arg9[%198, %c0_42] : memref<64x384xf32, #tpu.memory_space<vmem>>, vector<8x384xf32>
    %cst_43 = arith.constant dense<0.000000e+00> : vector<8x384xf32>
    %200 = tpu.matmul %195, %7, %cst_43 {dimension_numbers = #tpu.dot_dimension_numbers<[1], [0], [0], [1], [0, 0, 1, 1], [], []>} : vector<8x128xf32>, vector<128x384xf32>, vector<8x384xf32> -> vector<8x384xf32>
    %201 = vector.extract_strided_slice %199 {offsets = [0, 0], sizes = [8, 128], strides = [1, 1]} : vector<8x384xf32> to vector<8x128xf32>
    %202 = vector.extract_strided_slice %200 {offsets = [0, 0], sizes = [8, 128], strides = [1, 1]} : vector<8x384xf32> to vector<8x128xf32>
    %203 = arith.addf %201, %202 : vector<8x128xf32>
    %204 = arith.negf %203 : vector<8x128xf32>
    %205 = math.exp %204 : vector<8x128xf32>
    %cst_44 = arith.constant 1.000000e+00 : f32
    %206 = vector.broadcast %cst_44 : f32 to vector<8x128xf32>
    %207 = arith.addf %206, %205 : vector<8x128xf32>
    %208 = arith.divf %206, %207 : vector<8x128xf32>
    %209 = vector.extract_strided_slice %199 {offsets = [0, 128], sizes = [8, 128], strides = [1, 1]} : vector<8x384xf32> to vector<8x128xf32>
    %210 = vector.extract_strided_slice %200 {offsets = [0, 128], sizes = [8, 128], strides = [1, 1]} : vector<8x384xf32> to vector<8x128xf32>
    %211 = arith.addf %209, %210 : vector<8x128xf32>
    %212 = arith.negf %211 : vector<8x128xf32>
    %213 = math.exp %212 : vector<8x128xf32>
    %cst_45 = arith.constant 1.000000e+00 : f32
    %214 = vector.broadcast %cst_45 : f32 to vector<8x128xf32>
    %215 = arith.addf %214, %213 : vector<8x128xf32>
    %216 = arith.divf %214, %215 : vector<8x128xf32>
    %217 = vector.extract_strided_slice %199 {offsets = [0, 256], sizes = [8, 128], strides = [1, 1]} : vector<8x384xf32> to vector<8x128xf32>
    %218 = vector.extract_strided_slice %200 {offsets = [0, 256], sizes = [8, 128], strides = [1, 1]} : vector<8x384xf32> to vector<8x128xf32>
    %219 = vector.broadcast %8 : vector<1x128xf32> to vector<8x128xf32>
    %220 = arith.addf %218, %219 : vector<8x128xf32>
    %221 = arith.mulf %208, %220 : vector<8x128xf32>
    %222 = arith.addf %217, %221 : vector<8x128xf32>
    %223 = math.tanh %222 : vector<8x128xf32>
    %224 = arith.subf %195, %223 : vector<8x128xf32>
    %225 = arith.mulf %216, %224 : vector<8x128xf32>
    %226 = arith.addf %223, %225 : vector<8x128xf32>
    %c7_i32 = arith.constant 7 : i32
    %c8_i32_46 = arith.constant 8 : i32
    %227 = arith.muli %c7_i32, %c8_i32_46 : i32
    %228 = tpu.assume_multiple %227, 8 : i32
    %229 = arith.index_cast %228 : i32 to index
    %c0_47 = arith.constant 0 : index
    %230 = vector.load %arg9[%229, %c0_47] : memref<64x384xf32, #tpu.memory_space<vmem>>, vector<8x384xf32>
    %cst_48 = arith.constant dense<0.000000e+00> : vector<8x384xf32>
    %231 = tpu.matmul %226, %7, %cst_48 {dimension_numbers = #tpu.dot_dimension_numbers<[1], [0], [0], [1], [0, 0, 1, 1], [], []>} : vector<8x128xf32>, vector<128x384xf32>, vector<8x384xf32> -> vector<8x384xf32>
    %232 = vector.extract_strided_slice %230 {offsets = [0, 0], sizes = [8, 128], strides = [1, 1]} : vector<8x384xf32> to vector<8x128xf32>
    %233 = vector.extract_strided_slice %231 {offsets = [0, 0], sizes = [8, 128], strides = [1, 1]} : vector<8x384xf32> to vector<8x128xf32>
    %234 = arith.addf %232, %233 : vector<8x128xf32>
    %235 = arith.negf %234 : vector<8x128xf32>
    %236 = math.exp %235 : vector<8x128xf32>
    %cst_49 = arith.constant 1.000000e+00 : f32
    %237 = vector.broadcast %cst_49 : f32 to vector<8x128xf32>
    %238 = arith.addf %237, %236 : vector<8x128xf32>
    %239 = arith.divf %237, %238 : vector<8x128xf32>
    %240 = vector.extract_strided_slice %230 {offsets = [0, 128], sizes = [8, 128], strides = [1, 1]} : vector<8x384xf32> to vector<8x128xf32>
    %241 = vector.extract_strided_slice %231 {offsets = [0, 128], sizes = [8, 128], strides = [1, 1]} : vector<8x384xf32> to vector<8x128xf32>
    %242 = arith.addf %240, %241 : vector<8x128xf32>
    %243 = arith.negf %242 : vector<8x128xf32>
    %244 = math.exp %243 : vector<8x128xf32>
    %cst_50 = arith.constant 1.000000e+00 : f32
    %245 = vector.broadcast %cst_50 : f32 to vector<8x128xf32>
    %246 = arith.addf %245, %244 : vector<8x128xf32>
    %247 = arith.divf %245, %246 : vector<8x128xf32>
    %248 = vector.extract_strided_slice %230 {offsets = [0, 256], sizes = [8, 128], strides = [1, 1]} : vector<8x384xf32> to vector<8x128xf32>
    %249 = vector.extract_strided_slice %231 {offsets = [0, 256], sizes = [8, 128], strides = [1, 1]} : vector<8x384xf32> to vector<8x128xf32>
    %250 = vector.broadcast %8 : vector<1x128xf32> to vector<8x128xf32>
    %251 = arith.addf %249, %250 : vector<8x128xf32>
    %252 = arith.mulf %239, %251 : vector<8x128xf32>
    %253 = arith.addf %248, %252 : vector<8x128xf32>
    %254 = math.tanh %253 : vector<8x128xf32>
    %255 = arith.subf %226, %254 : vector<8x128xf32>
    %256 = arith.mulf %247, %255 : vector<8x128xf32>
    %257 = arith.addf %254, %256 : vector<8x128xf32>
    %c8_i32_51 = arith.constant 8 : i32
    %258 = arith.negf %257 : vector<8x128xf32>
    %259 = math.exp %258 : vector<8x128xf32>
    %cst_52 = arith.constant 1.000000e+00 : f32
    %260 = vector.broadcast %cst_52 : f32 to vector<8x128xf32>
    %261 = arith.addf %260, %259 : vector<8x128xf32>
    %262 = arith.divf %260, %261 : vector<8x128xf32>
    %c0_53 = arith.constant 0 : index
    %c0_54 = arith.constant 0 : index
    %263 = vector.load %arg6[%c0_53, %c0_54] : memref<128x128xf32, #tpu.memory_space<vmem>>, vector<128x128xf32>
    %cst_55 = arith.constant dense<0.000000e+00> : vector<8x128xf32>
    %264 = tpu.matmul %262, %263, %cst_55 {dimension_numbers = #tpu.dot_dimension_numbers<[1], [0], [0], [1], [0, 0, 1, 1], [], []>} : vector<8x128xf32>, vector<128x128xf32>, vector<8x128xf32> -> vector<8x128xf32>
    %c0_56 = arith.constant 0 : index
    %c0_57 = arith.constant 0 : index
    %265 = vector.load %arg7[%c0_56, %c0_57] : memref<1x128xf32, #tpu.memory_space<vmem>>, vector<1x128xf32>
    %266 = vector.broadcast %265 : vector<1x128xf32> to vector<8x128xf32>
    %267 = arith.addf %264, %266 : vector<8x128xf32>
    %c0_58 = arith.constant 0 : index
    %c0_59 = arith.constant 0 : index
    %268 = vector.load %arg8[%c0_58, %c0_59] : memref<8x128xf32, #tpu.memory_space<vmem>>, vector<8x128xf32>
    tpu.vector_store %arg8[%c0_58, %c0_59], %267 {strides = array<i32>} : memref<8x128xf32, #tpu.memory_space<vmem>>, vector<8x128xf32>,
    return
  }
  func.func @transform_0(%arg0: i32) -> (i32, i32) {
    %c0_i32 = arith.constant 0 : i32
    %c0_i32_0 = arith.constant 0 : i32
    %c0_i32_1 = arith.constant 0 : i32
    return %c0_i32, %c0_i32_0 : i32, i32
  }
  func.func @transform_1(%arg0: i32) -> (i32, i32) {
    %c0_i32 = arith.constant 0 : i32
    %c0_i32_0 = arith.constant 0 : i32
    %c0_i32_1 = arith.constant 0 : i32
    return %c0_i32, %c0_i32_0 : i32, i32
  }
  func.func @transform_2(%arg0: i32) -> (i32, i32) {
    %c0_i32 = arith.constant 0 : i32
    %c0_i32_0 = arith.constant 0 : i32
    %c0_i32_1 = arith.constant 0 : i32
    return %c0_i32, %c0_i32_0 : i32, i32
  }
  func.func @transform_3(%arg0: i32) -> (i32, i32) {
    %c0_i32 = arith.constant 0 : i32
    %c0_i32_0 = arith.constant 0 : i32
    %c0_i32_1 = arith.constant 0 : i32
    return %c0_i32, %c0_i32_0 : i32, i32
  }
  func.func @transform_4(%arg0: i32) -> (i32, i32) {
    %c0_i32 = arith.constant 0 : i32
    %c0_i32_0 = arith.constant 0 : i32
    %c0_i32_1 = arith.constant 0 : i32
    return %c0_i32, %c0_i32_0 : i32, i32
  }
  func.func @transform_5(%arg0: i32) -> (i32, i32) {
    %c0_i32 = arith.constant 0 : i32
    %c0_i32_0 = arith.constant 0 : i32
    %c0_i32_1 = arith.constant 0 : i32
    return %c0_i32, %c0_i32_0 : i32, i32
  }
  func.func @transform_6(%arg0: i32) -> (i32, i32) {
    %c0_i32 = arith.constant 0 : i32
    %c0_i32_0 = arith.constant 0 : i32
    %c0_i32_1 = arith.constant 0 : i32
    return %c0_i32, %c0_i32_0 : i32, i32
  }
  func.func @transform_7(%arg0: i32) -> (i32, i32) {
    %c0_i32 = arith.constant 0 : i32
    %c0_i32_0 = arith.constant 0 : i32
    %c0_i32_1 = arith.constant 0 : i32
    return %c0_i32, %c0_i32_0 : i32, i32
  }
}

</mosaic_0001>

<bundles_post_ra>
// kernel: tpu_custom_call.1
= control target key start
LH: loop header
LB: loop body
LE: loop exit
PB: predicated region body
PF: predicated region fallthrough
CT: control target
= control target key end

     0   :  { %12 = vsyncpa [#allocation4], 0  ;;  %s2387_s0 = inlined_call_operand.vmem [shape: f32[64,4], index: 0, kind: input, shape index: {}]   ;;  %s2388_s1 = inlined_call_operand.vmem [shape: f32[4,384], index: 1, kind: input, shape index: {}]   ;;  %s2389_s2 = inlined_call_operand.hbm [shape: f32[128,384], index: 2, kind: input, shape index: {}]   ;;  %s2390_s3 = inlined_call_operand.vmem [shape: f32[1,384], index: 3, kind: input, shape index: {}]   ;;  %s2391_s4 = inlined_call_operand.vmem [shape: f32[1,128], index: 4, kind: input, shape index: {}]   ;;  %s2392_s5 = inlined_call_operand.hbm [shape: f32[128,128], index: 5, kind: input, shape index: {}]   ;;  %s2393_s6 = inlined_call_operand.vmem [shape: f32[1,128], index: 6, kind: input, shape index: {}]   ;;  %s2394_s7 = inlined_call_operand.hbm [shape: f32[8,128], index: 7, kind: output, shape index: {}]  }
   0x1   :  { %13 = vsyncpa [#allocation7], 0 }
   0x2   :  { %14 = vsyncpa [#allocation5], 0  ;;  %s23_s26 = sshll.u32 %s2389_s2, 4  ;;  %s1570_s27 = smov [#allocation3]   ;;  %s24_s26 = int_to_ptr.hbm [resolvable:$true] %s23_s26 }
   0x3   :  { %s25_s28 = sshll.u32 %s1570_s27, 4  ;;  %s40_s8 = sshll.u32 %s2392_s5, 4  ;;  %s26_s28 = int_to_ptr.vmem [resolvable:$true] %s25_s28  ;;  %s41_s8 = int_to_ptr.hbm [resolvable:$true] %s40_s8 }
   0x4   :  { %s1571_s9 = smov 384   ;;  %s1572_s10 = smov 24  }
   0x5   :  { %31 = dma.hbm_to_vmem [thread:$0]  %s24_s26, 6144, %s26_s28, [#allocation4], %s1571_s9, %s1571_s9, %s1572_s10  }
   0x6   :  { %s1573_s11 = smov [#allocation6]   ;;  %s1574_s13 = smov 128  }
   0x7   :  { %s42_s12 = sshll.u32 %s1573_s11, 4  ;;  %s1575_s14 = smov 8   ;;  %s43_s12 = int_to_ptr.vmem [resolvable:$true] %s42_s12 }
   0x8   :  { %48 = dma.hbm_to_vmem [thread:$0]  %s41_s8, 2048, %s43_s12, [#allocation7], %s1574_s13, %s1574_s13, %s1575_s14  }
   0x9   :  { %1564 = dma.done.wait [#allocation4], 6144  }
   0xa   :  { %1565 = vsyncadd [#allocation4], 4294961152 }
   0xb   :  { %1566 = dma.done.wait [#allocation7], 2048  }
   0xc   :  { %1567 = vsyncadd [#allocation7], 4294965248  ;;  %v1624_v0 = vld [vmem:[#allocation3 + $0x168] sm:$0xff]  ;;  %v1626_v1 = vld [vmem:[#allocation3 + $0x150] sm:$0xff]  ;;  %vm110_vm0 = vcmask 1043456   ;;  %vm85_vm1 = vcmask 31744  }
   0xd   :  { %319 = vmatpush.msra.mxu3 %v1624_v0  ;;  %v67_v2 = vld [vmem:[%s2388_s1] sm:$0xff]  ;;  %v1635_v4 = vld [vmem:[#allocation3 + $0x120] sm:$0xff]  ;;  %v1638_v5 = vld [vmem:[#allocation3 + $0x108] sm:$0xff]  ;;  %v1576_v34 = vmov 0.0   ;;  %s1577_s14 = smov [#allocation8]   ;;  %s1287_s16 = sshll.u32 %s2394_s7, 4  ;;  %s1288_s16 = int_to_ptr.hbm [resolvable:$true] %s1287_s16 }
   0xe   :  { %v1632_v3 = vld [vmem:[#allocation3 + $0x138] sm:$0xff]  ;;  %79 = vst [vmem:[#allocation1] ss:$2 sm:$0xff] %v67_v2  ;;  %v1646_v7 = vld [vmem:[#allocation3 + $0xf0] sm:$0xff]  ;;  %v1657_v11 = vld [vmem:[#allocation3 + $0x160] sm:$0xff]  ;;  %s1285_s2 = sshll.u32 %s1577_s14, 4  ;;  %s1286_s2 = int_to_ptr.vmem [resolvable:$true] %s1285_s2 }
   0xf   :  { %320 = vmatpush.msra.mxu3 %v1626_v1  ;;  %v1644_v6 = vld [vmem:[%s2387_s0] sm:$0xff]  ;;  %v1659_v12 = vld [vmem:[#allocation3 + $0xc0] sm:$0xff]  ;;  %v1663_v13 = vld [vmem:[#allocation3 + $0x148] sm:$0xff] }
  0x10   :  { %v1649_v9 = vld [vmem:[#allocation3 + $0x178] sm:$0xff]  ;;  %v1665_v14 = vld [vmem:[#allocation3 + $0xa8] sm:$0xff]  ;;  %v1669_v15 = vld [vmem:[#allocation3 + $0x130] sm:$0xff] }
  0x11   :  { %321 = vmatpush.msra.mxu3 %v1632_v3  ;;  %v1652_v10 = vld [vmem:[#allocation3 + $0xd8] sm:$0xff]  ;;  %v1674_v16 = vld [vmem:[%s2387_s0 + $0x8] sm:$0xff]  ;;  %v1676_v17 = vld [vmem:[#allocation3 + $0x90] sm:$0xff] }
  0x12   :  { %v1680_v18 = vld [vmem:[#allocation3 + $0x118] sm:$0xff]  ;;  %v1688_v20 = vld [vmem:[#allocation3 + $0x100] sm:$0xff]  ;;  %v1694_v22 = vld [vmem:[#allocation3 + $0xe8] sm:$0xff] }
  0x13   :  { %322 = vmatpush.msra.mxu3 %v1635_v4  ;;  %v1682_v19 = vld [vmem:[#allocation3 + $0x78] sm:$0xff]  ;;  %v1690_v21 = vld [vmem:[#allocation3 + $0x60] sm:$0xff]  ;;  %v1696_v23 = vld [vmem:[#allocation3 + $0x48] sm:$0xff] }
  0x14   :  { %v1700_v24 = vld [vmem:[#allocation3 + $0xd0] sm:$0xff]  ;;  %v1705_v25 = vld [vmem:[%s2387_s0 + $0x10] sm:$0xff]  ;;  %v1711_v27 = vld [vmem:[#allocation3 + $0xb8] sm:$0xff] }
  0x15   :  { %v82_v8 = vld.sshfl [vmem:[#allocation1] sm:$0xff pattern:$0x75316420]  ;;  %323 = vmatpush.msra.mxu3 %v1638_v5  ;;  %v1707_v26 = vld [vmem:[#allocation3 + $0x30] sm:$0xff]  ;;  %v1719_v29 = vld [vmem:[#allocation3 + $0xa0] sm:$0xff] }
  0x16   :  { %1305 = vmatpush.msk.msra.mxu0 %vm110_vm0, %v82_v8  ;;  %2412 = vst [vmem:[#allocation12_spill] sm:$0xff] %v1707_v26  ;;  %v1713_v28 = vld [vmem:[#allocation3 + $0x18] sm:$0xff]  ;;  %v1721_v30 = vld [vmem:[#allocation3] sm:$0xff]  ;;  %v1725_v31 = vld [vmem:[#allocation3 + $0x88] sm:$0xff] }
  0x17   :  { %1306 = vmatmul.msk.f32.vlgmr.msra.gmra.mxu0 %vm85_vm1, %v1644_v6  ;;  %324 = vmatpush.msra.mxu3 %v1646_v7  ;;  %2413 = vst [vmem:[#allocation13_spill] sm:$0xff] %v1713_v28  ;;  %v68_v32 = vld [vmem:[%s2388_s1 + $0x8] sm:$0xf]  ;;  %v1730_v33 = vld [vmem:[#allocation3 + $0x170] sm:$0xff]  ;;  %v1740_v36 = vld [vmem:[#allocation3 + $0x158] sm:$0xff] }
  0x18   :  { %359 = vmatpush.msrb.mxu0 %v1649_v9  ;;  %2414 = vst [vmem:[#allocation14_spill] sm:$0xff] %v1721_v30  ;;  %v1738_v35 = vld [vmem:[%s2387_s0 + $0x18] sm:$0xff]  ;;  %v1746_v38 = vld [vmem:[#allocation3 + $0x140] sm:$0xff]  ;;  %v1752_v40 = vld [vmem:[#allocation3 + $0x58] sm:$0xff] }
  0x19   :  { %325 = vmatpush.msra.mxu3 %v1652_v10  ;;  %81 = vst [vmem:[#allocation1 + $0x10] ss:$2 sm:$0xff] %v68_v32  ;;  %v1743_v37 = vld [vmem:[#allocation3 + $0x70] sm:$0xff]  ;;  %v83_v39 = vld.sshfl [vmem:[#allocation1 + $0x8] sm:$0xff pattern:$0x75316420] }
  0x1a   :  { %360 = vmatpush.msrb.mxu0 %v1657_v11  ;;  %v1754_v41 = vld [vmem:[#allocation3 + $0x40] sm:$0xff]  ;;  %v1756_v42 = vld [vmem:[#allocation3 + $0x128] sm:$0xff]  ;;  %1314 = vmatpush.msk.msra.mxu1 %vm110_vm0, %v83_v39  ;;  %v1765_v45 = vld [vmem:[#allocation3 + $0x110] sm:$0xff] }
  0x1b   :  { %326 = vmatpush.msra.mxu3 %v1659_v12  ;;  %2415 = vst [vmem:[#allocation15_spill] sm:$0xff] %v1754_v41  ;;  %1315 = vmatmul.msk.f32.vlgmr.msra.gmra.mxu1 %vm85_vm1, %v1644_v6  ;;  %v1763_v44 = vld [vmem:[#allocation3 + $0x28] sm:$0xff]  ;;  %v1772_v46 = vld [vmem:[#allocation3 + $0x10] sm:$0xff]  ;;  %v1777_v47 = vld [vmem:[%s2387_s0 + $0x20] sm:$0xff] }
  0x1c   :  { %361 = vmatpush.msrb.mxu0 %v1663_v13  ;;  %2416 = vst [vmem:[#allocation16_spill] sm:$0xff] %v1763_v44  ;;  %v1779_v48 = vld [vmem:[#allocation3 + $0xf8] sm:$0xff]  ;;  %435 = vmatpush.msrb.mxu1 %v1624_v0  ;;  %v1785_v49 = vld [vmem:[#allocation3 + $0xe0] sm:$0xff]  ;;  %v1792_v50 = vld [vmem:[#allocation3 + $0xc8] sm:$0xff] }
  0x1d   :  { %327 = vmatpush.msra.mxu3 %v1665_v14  ;;  %2417 = vst [vmem:[#allocation17_spill] sm:$0xff] %v1772_v46  ;;  %v1799_v51 = vld [vmem:[#allocation3 + $0xb0] sm:$0xff]  ;;  %v1809_v52 = vld [vmem:[%s2387_s0 + $0x28] sm:$0xff]  ;;  %v1811_v53 = vld [vmem:[#allocation3 + $0x98] sm:$0xff] }
  0x1e   :  { %362 = vmatpush.msrb.mxu0 %v1669_v15  ;;  %436 = vmatpush.msrb.mxu1 %v1626_v1  ;;  %v1817_v54 = vld [vmem:[#allocation3 + $0x80] sm:$0xff]  ;;  %v1824_v55 = vld [vmem:[#allocation3 + $0x68] sm:$0xff]  ;;  %v1831_v56 = vld [vmem:[#allocation3 + $0x50] sm:$0xff] }
  0x1f   :  { %1307 = vmatmul.msk.f32.gmra.mxu0 %vm85_vm1, %v1674_v16  ;;  %328 = vmatpush.msra.mxu3 %v1676_v17  ;;  %v1841_v57 = vld [vmem:[%s2387_s0 + $0x30] sm:$0xff]  ;;  %v1843_v58 = vld [vmem:[#allocation3 + $0x38] sm:$0xff]  ;;  %v1849_v59 = vld [vmem:[#allocation3 + $0x20] sm:$0xff] }
  0x20   :  { %363 = vmatpush.msrb.mxu0 %v1680_v18  ;;  %v84_v43 = vld.sshfl [vmem:[#allocation1 + $0x10] sm:$0xff pattern:$0x75316420]  ;;  %437 = vmatpush.msrb.mxu1 %v1632_v3  ;;  %2418 = vst [vmem:[#allocation18_spill] sm:$0xff] %v1843_v58  ;;  %v66_v61 = vld [vmem:[%s2387_s0 + $0x38] sm:$0xff] }
  0x21   :  { %329 = vmatpush.msra.mxu3 %v1682_v19  ;;  %1323 = vmatpush.msk.msra.mxu2 %vm110_vm0, %v84_v43  ;;  %2419 = vst [vmem:[#allocation19_spill] sm:$0xff] %v1849_v59  ;;  %v1856_v60 = vld [vmem:[#allocation3 + $0x8] sm:$0xff]  ;;  %v69_v63 = vld [vmem:[%s2390_s3] sm:$0x7] }
  0x22   :  { %364 = vmatpush.msrb.mxu0 %v1688_v20  ;;  %1324 = vmatmul.msk.f32.vlgmr.msra.gmra.mxu2 %vm85_vm1, %v1644_v6  ;;  %2420 = vst [vmem:[#allocation20_spill] sm:$0xff] %v1856_v60  ;;  %v71_v2 = vperm.slane %v69_v63, 0 }
  0x23   :  { %330 = vmatpush.msra.mxu3 %v1690_v21  ;;  %455 = vmatpush.msrb.mxu2 %v1730_v33 }
  0x24   :  { %365 = vmatpush.msrb.mxu0 %v1694_v22  ;;  %1316 = vmatmul.msk.f32.gmra.mxu1 %vm85_vm1, %v1674_v16 }
  0x25   :  { %331 = vmatpush.msra.mxu3 %v1696_v23  ;;  %456 = vmatpush.msrb.mxu2 %v1740_v36 }
  0x26   :  { %366 = vmatpush.msrb.mxu0 %v1700_v24  ;;  %438 = vmatpush.msrb.mxu1 %v1635_v4 }
  0x27   :  { %1308 = vmatmul.msk.f32.gmra.mxu0 %vm85_vm1, %v1705_v25  ;;  %332 = vmatpush.msra.mxu3 %v1707_v26 }
  0x28   :  { %367 = vmatpush.msrb.mxu0 %v1711_v27  ;;  %457 = vmatpush.msrb.mxu2 %v1746_v38 }
  0x29   :  { %333 = vmatpush.msra.mxu3 %v1713_v28  ;;  %439 = vmatpush.msrb.mxu1 %v1638_v5 }
  0x2a   :  { %368 = vmatpush.msrb.mxu0 %v1719_v29  ;;  %1325 = vmatmul.msk.f32.gmra.mxu2 %vm85_vm1, %v1674_v16 }
  0x2b   :  { %334 = vmatpush.msra.mxu3 %v1721_v30  ;;  %458 = vmatpush.msrb.mxu2 %v1756_v42 }
  0x2c   :  { %335 = vmatmul.f32.vlgmr.msra.gmra.mxu3 %v1576_v34  ;;  %369 = vmatpush.msrb.mxu0 %v1725_v31 }
  0x2d   :  { %339 = vmatpush.msrb.mxu3 %v1730_v33  ;;  %440 = vmatpush.msrb.mxu1 %v1646_v7 }
  0x2e   :  { %370 = vmatpush.msrb.mxu0 %v1743_v37  ;;  %459 = vmatpush.msrb.mxu2 %v1765_v45 }
  0x2f   :  { %1309 = vmatmul.msk.f32.gmra.mxu0 %vm85_vm1, %v1738_v35  ;;  %340 = vmatpush.msrb.mxu3 %v1740_v36 }
  0x30   :  { %371 = vmatpush.msrb.mxu0 %v1752_v40  ;;  %441 = vmatpush.msrb.mxu1 %v1652_v10 }
  0x31   :  { %341 = vmatpush.msrb.mxu3 %v1746_v38  ;;  %460 = vmatpush.msrb.mxu2 %v1779_v48 }
  0x32   :  { %372 = vmatpush.msrb.mxu0 %v1754_v41  ;;  %1317 = vmatmul.msk.f32.gmra.mxu1 %vm85_vm1, %v1705_v25 }
  0x33   :  { %342 = vmatpush.msrb.mxu3 %v1756_v42  ;;  %442 = vmatpush.msrb.mxu1 %v1659_v12 }
  0x34   :  { %373 = vmatpush.msrb.mxu0 %v1763_v44  ;;  %461 = vmatpush.msrb.mxu2 %v1785_v49 }
  0x35   :  { %343 = vmatpush.msrb.mxu3 %v1765_v45  ;;  %1326 = vmatmul.msk.f32.gmra.mxu2 %vm85_vm1, %v1705_v25 }
  0x36   :  { %374 = vmatpush.msrb.mxu0 %v1772_v46  ;;  %443 = vmatpush.msrb.mxu1 %v1665_v14 }
  0x37   :  { %1310 = vmatmul.msk.f32.gmra.mxu0 %vm85_vm1, %v1777_v47  ;;  %344 = vmatpush.msrb.mxu3 %v1779_v48 }
  0x38   :  { %548 = vmatpush.msra.mxu0 %v1624_v0  ;;  %462 = vmatpush.msrb.mxu2 %v1792_v50 }
  0x39   :  { %345 = vmatpush.msrb.mxu3 %v1785_v49  ;;  %444 = vmatpush.msrb.mxu1 %v1676_v17 }
  0x3a   :  { %549 = vmatpush.msra.mxu0 %v1626_v1  ;;  %463 = vmatpush.msrb.mxu2 %v1799_v51 }
  0x3b   :  { %346 = vmatpush.msrb.mxu3 %v1792_v50  ;;  %445 = vmatpush.msrb.mxu1 %v1682_v19 }
  0x3c   :  { %464 = vmatpush.msrb.mxu2 %v1811_v53  ;;  %1318 = vmatmul.msk.f32.gmra.mxu1 %vm85_vm1, %v1738_v35 }
  0x3d   :  { %347 = vmatpush.msrb.mxu3 %v1799_v51  ;;  %446 = vmatpush.msrb.mxu1 %v1690_v21 }
  0x3e   :  { %465 = vmatpush.msrb.mxu2 %v1817_v54  ;;  %550 = vmatpush.msra.mxu0 %v1632_v3 }
  0x3f   :  { %1311 = vmatmul.msk.f32.gmra.mxu0 %vm85_vm1, %v1809_v52  ;;  %348 = vmatpush.msrb.mxu3 %v1811_v53 }
  0x40   :  { %1327 = vmatmul.msk.f32.gmra.mxu2 %vm85_vm1, %v1738_v35  ;;  %447 = vmatpush.msrb.mxu1 %v1696_v23 }
  0x41   :  { %349 = vmatpush.msrb.mxu3 %v1817_v54  ;;  %466 = vmatpush.msrb.mxu2 %v1824_v55 }
  0x42   :  { %448 = vmatpush.msrb.mxu1 %v1707_v26  ;;  %551 = vmatpush.msra.mxu0 %v1635_v4 }
  0x43   :  { %350 = vmatpush.msrb.mxu3 %v1824_v55  ;;  %467 = vmatpush.msrb.mxu2 %v1831_v56 }
  0x44   :  { %449 = vmatpush.msrb.mxu1 %v1713_v28  ;;  %552 = vmatpush.msra.mxu0 %v1638_v5 }
  0x45   :  { %351 = vmatpush.msrb.mxu3 %v1831_v56  ;;  %1319 = vmatmul.msk.f32.gmra.mxu1 %vm85_vm1, %v1777_v47 }
  0x46   :  { %468 = vmatpush.msrb.mxu2 %v1843_v58  ;;  %450 = vmatpush.msrb.mxu1 %v1721_v30 }
  0x47   :  { %1312 = vmatmul.msk.f32.gmra.mxu0 %vm85_vm1, %v1841_v57  ;;  %352 = vmatpush.msrb.mxu3 %v1843_v58 }
  0x48   :  { %1328 = vmatmul.msk.f32.gmra.mxu2 %vm85_vm1, %v1777_v47  ;;  %568 = vmatpush.msra.mxu1 %v1730_v33 }
  0x49   :  { %353 = vmatpush.msrb.mxu3 %v1849_v59  ;;  %469 = vmatpush.msrb.mxu2 %v1849_v59 }
  0x4a   :  { %569 = vmatpush.msra.mxu1 %v1740_v36  ;;  %553 = vmatpush.msra.mxu0 %v1646_v7 }
  0x4b   :  { %354 = vmatpush.msrb.mxu3 %v1856_v60  ;;  %470 = vmatpush.msrb.mxu2 %v1856_v60 }
  0x4c   :  { %355 = vmatmul.f32.vlgmr.msrb.gmra.mxu3 %v1576_v34  ;;  %570 = vmatpush.msra.mxu1 %v1746_v38 }
  0x4d   :  { %475 = vmatpush.msra.mxu3 %v1649_v9  ;;  %588 = vmatpush.msra.mxu2 %v1649_v9 }
  0x4e   :  { %1320 = vmatmul.msk.f32.gmra.mxu1 %vm85_vm1, %v1809_v52  ;;  %554 = vmatpush.msra.mxu0 %v1652_v10 }
  0x4f   :  { %1313 = vmatmul.msk.f32.gmra.mxu0 %vm85_vm1, %v66_v61  ;;  %476 = vmatpush.msra.mxu3 %v1657_v11 }
  0x50   :  { %589 = vmatpush.msra.mxu2 %v1657_v11  ;;  %571 = vmatpush.msra.mxu1 %v1756_v42 }
  0x51   :  { %477 = vmatpush.msra.mxu3 %v1663_v13  ;;  %1329 = vmatmul.msk.f32.gmra.mxu2 %vm85_vm1, %v1809_v52 }
  0x52   :  { %590 = vmatpush.msra.mxu2 %v1663_v13  ;;  %572 = vmatpush.msra.mxu1 %v1765_v45 }
  0x53   :  { %478 = vmatpush.msra.mxu3 %v1669_v15  ;;  %555 = vmatpush.msra.mxu0 %v1659_v12 }
  0x54   :  { %591 = vmatpush.msra.mxu2 %v1669_v15  ;;  %573 = vmatpush.msra.mxu1 %v1779_v48 }
  0x55   :  { %479 = vmatpush.msra.mxu3 %v1680_v18  ;;  %556 = vmatpush.msra.mxu0 %v1665_v14 }
  0x56   :  { %592 = vmatpush.msra.mxu2 %v1680_v18  ;;  %1321 = vmatmul.msk.f32.gmra.mxu1 %vm85_vm1, %v1841_v57 }
  0x57   :  { %375 = vmatmul.f32.vlgmr.msrb.gmra.mxu0 %v1576_v34  ;;  %480 = vmatpush.msra.mxu3 %v1688_v20 }
  0x58   :  { %593 = vmatpush.msra.mxu2 %v1688_v20  ;;  %574 = vmatpush.msra.mxu1 %v1785_v49 }
  0x59   :  { %481 = vmatpush.msra.mxu3 %v1694_v22  ;;  %1330 = vmatmul.msk.f32.gmra.mxu2 %vm85_vm1, %v1841_v57 }
  0x5a   :  { %594 = vmatpush.msra.mxu2 %v1694_v22  ;;  %575 = vmatpush.msra.mxu1 %v1792_v50 }
  0x5b   :  { %482 = vmatpush.msra.mxu3 %v1700_v24  ;;  %557 = vmatpush.msra.mxu0 %v1676_v17 }
  0x5c   :  { %595 = vmatpush.msra.mxu2 %v1700_v24  ;;  %576 = vmatpush.msra.mxu1 %v1799_v51 }
  0x5d   :  { %483 = vmatpush.msra.mxu3 %v1711_v27  ;;  %558 = vmatpush.msra.mxu0 %v1682_v19 }
  0x5e   :  { %596 = vmatpush.msra.mxu2 %v1711_v27  ;;  %1322 = vmatmul.msk.f32.gmra.mxu1 %vm85_vm1, %v66_v61 }
  0x5f   :  { %484 = vmatpush.msra.mxu3 %v1719_v29  ;;  %577 = vmatpush.msra.mxu1 %v1811_v53 }
  0x60   :  { %597 = vmatpush.msra.mxu2 %v1719_v29  ;;  %559 = vmatpush.msra.mxu0 %v1690_v21 }
  0x61   :  { %485 = vmatpush.msra.mxu3 %v1725_v31  ;;  %1331 = vmatmul.msk.f32.gmra.mxu2 %vm85_vm1, %v66_v61 }
  0x62   :  { %578 = vmatpush.msra.mxu1 %v1817_v54  ;;  %598 = vmatpush.msra.mxu2 %v1725_v31 }
  0x63   :  { %486 = vmatpush.msra.mxu3 %v1743_v37  ;;  %560 = vmatpush.msra.mxu0 %v1696_v23 }
  0x64   :  { %579 = vmatpush.msra.mxu1 %v1824_v55  ;;  %599 = vmatpush.msra.mxu2 %v1743_v37 }
  0x65   :  { %487 = vmatpush.msra.mxu3 %v1752_v40  ;;  %561 = vmatpush.msra.mxu0 %v1707_v26 }
  0x66   :  { %580 = vmatpush.msra.mxu1 %v1831_v56  ;;  %600 = vmatpush.msra.mxu2 %v1752_v40 }
  0x67   :  { %488 = vmatpush.msra.mxu3 %v1754_v41  ;;  %562 = vmatpush.msra.mxu0 %v1713_v28 }
  0x68   :  { %581 = vmatpush.msra.mxu1 %v1843_v58  ;;  %601 = vmatpush.msra.mxu2 %v1754_v41 }
  0x69   :  { %489 = vmatpush.msra.mxu3 %v1763_v44  ;;  %563 = vmatpush.msra.mxu0 %v1721_v30 }
  0x6a   :  { %582 = vmatpush.msra.mxu1 %v1849_v59  ;;  %602 = vmatpush.msra.mxu2 %v1763_v44 }
  0x6b   :  { %490 = vmatpush.msra.mxu3 %v1772_v46  ;;  %681 = vmatpush.msrb.mxu0 %v1730_v33 }
  0x6c   :  { %583 = vmatpush.msra.mxu1 %v1856_v60  ;;  %603 = vmatpush.msra.mxu2 %v1772_v46 }
  0x6d   :  { %661 = vmatpush.msrb.mxu3 %v1624_v0  ;;  %682 = vmatpush.msrb.mxu0 %v1740_v36 }
  0x6f   :  { %662 = vmatpush.msrb.mxu3 %v1626_v1  ;;  %683 = vmatpush.msrb.mxu0 %v1746_v38 }
  0x71   :  { %663 = vmatpush.msrb.mxu3 %v1632_v3  ;;  %684 = vmatpush.msrb.mxu0 %v1756_v42 }
  0x73   :  { %664 = vmatpush.msrb.mxu3 %v1635_v4  ;;  %685 = vmatpush.msrb.mxu0 %v1765_v45 }
  0x75   :  { %665 = vmatpush.msrb.mxu3 %v1638_v5  ;;  %686 = vmatpush.msrb.mxu0 %v1779_v48 }
  0x77   :  { %666 = vmatpush.msrb.mxu3 %v1646_v7  ;;  %687 = vmatpush.msrb.mxu0 %v1785_v49 }
  0x79   :  { %667 = vmatpush.msrb.mxu3 %v1652_v10  ;;  %688 = vmatpush.msrb.mxu0 %v1792_v50 }
  0x7b   :  { %668 = vmatpush.msrb.mxu3 %v1659_v12  ;;  %689 = vmatpush.msrb.mxu0 %v1799_v51 }
  0x7d   :  { %669 = vmatpush.msrb.mxu3 %v1665_v14  ;;  %690 = vmatpush.msrb.mxu0 %v1811_v53 }
  0x7f   :  { %670 = vmatpush.msrb.mxu3 %v1676_v17  ;;  %691 = vmatpush.msrb.mxu0 %v1817_v54 }
  0x81   :  { %671 = vmatpush.msrb.mxu3 %v1682_v19  ;;  %692 = vmatpush.msrb.mxu0 %v1824_v55 }
  0x83   :  { %672 = vmatpush.msrb.mxu3 %v1690_v21  ;;  %693 = vmatpush.msrb.mxu0 %v1831_v56 }
  0x85   :  { %673 = vmatpush.msrb.mxu3 %v1696_v23  ;;  %694 = vmatpush.msrb.mxu0 %v1843_v58 }
  0x87   :  { %674 = vmatpush.msrb.mxu3 %v1707_v26  ;;  %695 = vmatpush.msrb.mxu0 %v1849_v59 }
  0x89   :  { %675 = vmatpush.msrb.mxu3 %v1713_v28  ;;  %696 = vmatpush.msrb.mxu0 %v1856_v60 }
  0x8b   :  { %676 = vmatpush.msrb.mxu3 %v1721_v30 }
  0x94   :  { %v134_v62 = vpop.f32.mrf.mxu0 }
  0x95   :  { %v135_v35 = vadd.f32 %v134_v62, %v71_v2 }
  0x98   :  { %v175_v62 = vpop.f32.mrf.mxu1 }
  0x9c   :  { %v137_v6 = vpop.f32.mrf.mxu0 }
  0x9d   :  { %v1994_v8 = vadd.f32 %v137_v6, %v71_v2 }
  0x9f   :  { %2421 = vst [vmem:[#allocation21_spill] sm:$0xff] %v1994_v8 }
  0xa4   :  { %v140_v16 = vpop.f32.mrf.mxu0 }
  0xa5   :  { %v1996_v25 = vadd.f32 %v140_v16, %v71_v2 }
  0xa7   :  { %2422 = vst [vmem:[#allocation22_spill] sm:$0xff] %v1996_v25 }
  0xac   :  { %v143_v32 = vpop.f32.mrf.mxu0 }
  0xad   :  { %v1998_v34 = vadd.f32 %v143_v32, %v71_v2 }
  0xaf   :  { %2423 = vst [vmem:[#allocation23_spill] sm:$0xff] %v1998_v34  ;;  %v336_v39 = vpop.f32.mrf.mxu3  ;;  %v2006_v34 = vperm.slane %v69_v63, 1 }
  0xb0   :  { %v379_v43 = vadd.f32 %v336_v39, %v135_v35 }
  0xb1   :  { %2427 = vst [vmem:[#allocation27_spill] sm:$0xff] %v2006_v34 }
  0xb2   :  { %v1332_v47 = vmul.f32 -1.442695, %v379_v43  ;;  %v176_v43 = vadd.f32 %v175_v62, %v2006_v34 }
  0xb4   :  { %1359 = vpow2.f32 %v1332_v47  ;;  %v146_v52 = vpop.f32.mrf.mxu0 }
  0xb5   :  { %v2000_v57 = vadd.f32 %v146_v52, %v71_v2 }
  0xb7   :  { %2424 = vst [vmem:[#allocation24_spill] sm:$0xff] %v2000_v57 }
  0xba   :  { %v1360_v61 = vpop.eup %1359 }
  0xbb   :  { %v383_v60 = vadd.f32 1.0, %v1360_v61 }
  0xbc   :  { %v149_v30 = vpop.f32.mrf.mxu0 }
  0xbd   :  { %v2002_v46 = vadd.f32 %v149_v30, %v71_v2  ;;  %1361 = vrcp.f32 %v383_v60  ;;  %v395_v8 = vand.u32 2147483648, %v383_v60  ;;  %vm389_vm3 = vweird.f32 %v383_v60 }
  0xbf   :  { %2425 = vst [vmem:[#allocation25_spill] sm:$0xff] %v2002_v46 }
  0xc3   :  { %v1362_v6 = vpop.eup %1361 }
  0xc4   :  { %v152_v16 = vpop.f32.mrf.mxu0  ;;  %v385_v32 = vmul.f32 %v1362_v6, %v383_v60  ;;  %vm390_vm2 = vweird.f32 %v1362_v6 }
  0xc5   :  { %v2004_v25 = vadd.f32 %v152_v16, %v71_v2  ;;  %v2014_v16 = vld [vmem:[%s2391_s4] ss:$0 sm:$0xff]  ;;  %vm391_vm4 = vmor %vm389_vm3, %vm390_vm2 }
  0xc6   :  { %v386_v35 = vsub.f32 1.0, %v385_v32  ;;  %v393_v32 = vand.u32 2147483647, %v383_v60 }
  0xc7   :  { %2426 = vst [vmem:[#allocation26_spill] sm:$0xff] %v2004_v25 }
  0xc8   :  { %v387_v61 = vmul.f32 %v1362_v6, %v386_v35  ;;  %v396_v35 = vor.u32 1.1754944e-38, %v395_v8  ;;  %vm394_vm5 = vcmp.eq.f32.partialorder %v393_v32, 8.507059e+37 }
  0xca   :  { %v388_v46 = vadd.f32 %v1362_v6, %v387_v61 }
  0xcc   :  { %v155_v39 = vpop.f32.mrf.mxu0  ;;  %v392_v62 = vsel %vm391_vm4, %v1362_v6, %v388_v46 }
  0xcd   :  { %v2009_v47 = vadd.f32 %v155_v39, %v71_v2  ;;  %v2017_v39 = vperm.slane %v69_v63, 2 }
  0xcf   :  { %2428 = vst [vmem:[#allocation28_spill] sm:$0xff] %v2009_v47  ;;  %v356_v52 = vpop.f32.mrf.mxu3 }
  0xd0   :  { %v399_v57 = vadd.f32 %v356_v52, %v176_v43  ;;  %v397_v52 = vsel %vm394_vm5, %v396_v35, %v392_v62 }
  0xd2   :  { %v1333_v30 = vmul.f32 -1.442695, %v399_v57  ;;  %v216_v57 = vpop.f32.mrf.mxu2 }
  0xd3   :  { %v217_v34 = vadd.f32 %v216_v57, %v2017_v39 }
  0xd4   :  { %1363 = vpow2.f32 %v1333_v30  ;;  %v376_v25 = vpop.f32.mrf.mxu0 }
  0xd5   :  { %v422_v2 = vadd.f32 %v2014_v16, %v376_v25 }
  0xd7   :  { %v423_v47 = vmul.f32 %v422_v2, %v397_v52  ;;  %v2433_v52 = vld [vmem:[#allocation20_spill] sm:$0xff] }
  0xd9   :  { %v424_v30 = vadd.f32 %v423_v47, %v217_v34  ;;  %v2431_v34 = vld [vmem:[#allocation17_spill] sm:$0xff]  ;;  %v2432_v47 = vld [vmem:[#allocation14_spill] sm:$0xff] }
  0xda   :  { %v1364_v43 = vpop.eup %1363 }
  0xdb   :  { %v403_v61 = vadd.f32 1.0, %v1364_v43 }
  0xdd   :  { %1365 = vrcp.f32 %v403_v61  ;;  %v415_v46 = vand.u32 2147483648, %v403_v61  ;;  %v413_v63 = vand.u32 2147483647, %v403_v61  ;;  %vm409_vm7 = vweird.f32 %v403_v61 }
  0xde   :  { %1367 = vtanh.f32 %v424_v30  ;;  %v219_v30 = vpop.f32.mrf.mxu2 }
  0xdf   :  { %v416_v32 = vor.u32 1.1754944e-38, %v415_v46  ;;  %vm414_vm9 = vcmp.eq.f32.partialorder %v413_v63, 8.507059e+37 }
  0xe3   :  { %v1366_v59 = vpop.eup %1365 }
  0xe4   :  { %v405_v60 = vmul.f32 %v1366_v59, %v403_v61  ;;  %vm410_vm6 = vweird.f32 %v1366_v59  ;;  %v1368_v25 = vpop.eup %1367  ;;  %v178_v61 = vpop.f32.mrf.mxu1 }
  0xe5   :  { %vm411_vm8 = vmor %vm409_vm7, %vm410_vm6  ;;  %v426_v62 = vsub.f32 0.0, %v1368_v25 }
  0xe6   :  { %v406_v28 = vsub.f32 1.0, %v405_v60  ;;  %v2075_v46 = vpop.f32.mrf.mxu2 }
  0xe7   :  { %2435 = vst [vmem:[#allocation30_spill] sm:$0xff] %v2075_v46 }
  0xe8   :  { %v407_v6 = vmul.f32 %v1366_v59, %v406_v28  ;;  %v2429_v28 = vld [vmem:[#allocation13_spill] sm:$0xff] }
  0xea   :  { %v408_v8 = vadd.f32 %v1366_v59, %v407_v6 }
  0xec   :  { %v412_v35 = vsel %vm411_vm8, %v1366_v59, %v408_v8  ;;  %v2430_v59 = vld [vmem:[#allocation19_spill] sm:$0xff]  ;;  %v2073_v60 = vpop.f32.mrf.mxu1 }
  0xed   :  { %v417_v2 = vsel %vm414_vm9, %v416_v32, %v412_v35  ;;  %2434 = vst [vmem:[#allocation29_spill] sm:$0xff] %v2073_v60 }
  0xee   :  { %v427_v57 = vmul.f32 %v426_v62, %v417_v2  ;;  %v2079_v63 = vpop.f32.mrf.mxu2 }
  0xef   :  { %2437 = vst [vmem:[#allocation32_spill] sm:$0xff] %v2079_v63 }
  0xf0   :  { %v2020_v43 = vadd.f32 %v1368_v25, %v427_v57 }
  0xf2   :  { %451 = vmatmul.f32.vlgmr.msrb.gmra.mxu1 %v2020_v43  ;;  %471 = vmatmul.f32.vlgmr.msrb.gmra.mxu2 %v2020_v43 }
  0xf3   :  { %491 = vmatmul.f32.vlgmr.msra.gmra.mxu3 %v2020_v43  ;;  %701 = vmatpush.msrb.mxu1 %v1649_v9 }
  0xf4   :  { %774 = vmatpush.msrb.mxu2 %v1624_v0  ;;  %794 = vmatpush.msra.mxu3 %v1730_v33  ;;  %v2077_v6 = vpop.f32.mrf.mxu1 }
  0xf5   :  { %702 = vmatpush.msrb.mxu1 %v1657_v11  ;;  %2436 = vst [vmem:[#allocation31_spill] sm:$0xff] %v2077_v6  ;;  %v2446_v6 = vld [vmem:[#allocation21_spill] sm:$0xff] }
  0xf6   :  { %775 = vmatpush.msrb.mxu2 %v1626_v1  ;;  %795 = vmatpush.msra.mxu3 %v1740_v36  ;;  %v2083_v8 = vpop.f32.mrf.mxu2 }
  0xf7   :  { %703 = vmatpush.msrb.mxu1 %v1663_v13  ;;  %2439 = vst [vmem:[#allocation34_spill] sm:$0xff] %v2083_v8 }
  0xf8   :  { %776 = vmatpush.msrb.mxu2 %v1632_v3  ;;  %796 = vmatpush.msra.mxu3 %v1746_v38 }
  0xf9   :  { %704 = vmatpush.msrb.mxu1 %v1669_v15 }
  0xfa   :  { %777 = vmatpush.msrb.mxu2 %v1635_v4  ;;  %797 = vmatpush.msra.mxu3 %v1756_v42 }
  0xfb   :  { %705 = vmatpush.msrb.mxu1 %v1680_v18 }
  0xfc   :  { %778 = vmatpush.msrb.mxu2 %v1638_v5  ;;  %798 = vmatpush.msra.mxu3 %v1765_v45  ;;  %v2081_v25 = vpop.f32.mrf.mxu1 }
  0xfd   :  { %706 = vmatpush.msrb.mxu1 %v1688_v20  ;;  %2438 = vst [vmem:[#allocation33_spill] sm:$0xff] %v2081_v25 }
  0xfe   :  { %779 = vmatpush.msrb.mxu2 %v1646_v7  ;;  %799 = vmatpush.msra.mxu3 %v1779_v48  ;;  %v2087_v62 = vpop.f32.mrf.mxu2 }
  0xff   :  { %707 = vmatpush.msrb.mxu1 %v1694_v22  ;;  %2441 = vst [vmem:[#allocation36_spill] sm:$0xff] %v2087_v62 }
 0x100   :  { %780 = vmatpush.msrb.mxu2 %v1652_v10  ;;  %800 = vmatpush.msra.mxu3 %v1785_v49 }
 0x101   :  { %708 = vmatpush.msrb.mxu1 %v1700_v24 }
 0x102   :  { %781 = vmatpush.msrb.mxu2 %v1659_v12  ;;  %801 = vmatpush.msra.mxu3 %v1792_v50 }
 0x103   :  { %709 = vmatpush.msrb.mxu1 %v1711_v27 }
 0x104   :  { %782 = vmatpush.msrb.mxu2 %v1665_v14  ;;  %802 = vmatpush.msra.mxu3 %v1799_v51  ;;  %v2085_v32 = vpop.f32.mrf.mxu1 }
 0x105   :  { %710 = vmatpush.msrb.mxu1 %v1719_v29  ;;  %2440 = vst [vmem:[#allocation35_spill] sm:$0xff] %v2085_v32 }
 0x106   :  { %783 = vmatpush.msrb.mxu2 %v1676_v17  ;;  %803 = vmatpush.msra.mxu3 %v1811_v53  ;;  %v2091_v2 = vpop.f32.mrf.mxu2 }
 0x107   :  { %711 = vmatpush.msrb.mxu1 %v1725_v31  ;;  %2443 = vst [vmem:[#allocation38_spill] sm:$0xff] %v2091_v2 }
 0x108   :  { %784 = vmatpush.msrb.mxu2 %v1682_v19  ;;  %804 = vmatpush.msra.mxu3 %v1817_v54 }
 0x109   :  { %712 = vmatpush.msrb.mxu1 %v1743_v37 }
 0x10a   :  { %785 = vmatpush.msrb.mxu2 %v1690_v21  ;;  %805 = vmatpush.msra.mxu3 %v1824_v55 }
 0x10b   :  { %713 = vmatpush.msrb.mxu1 %v1752_v40 }
 0x10c   :  { %786 = vmatpush.msrb.mxu2 %v1696_v23  ;;  %806 = vmatpush.msra.mxu3 %v1831_v56  ;;  %v2089_v35 = vpop.f32.mrf.mxu1 }
 0x10d   :  { %714 = vmatpush.msrb.mxu1 %v1754_v41  ;;  %2442 = vst [vmem:[#allocation37_spill] sm:$0xff] %v2089_v35 }
 0x10e   :  { %787 = vmatpush.msrb.mxu2 %v1707_v26  ;;  %807 = vmatpush.msra.mxu3 %v1843_v58  ;;  %v2095_v60 = vpop.f32.mrf.mxu2 }
 0x10f   :  { %715 = vmatpush.msrb.mxu1 %v1763_v44  ;;  %2445 = vst [vmem:[#allocation40_spill] sm:$0xff] %v2095_v60 }
 0x110   :  { %788 = vmatpush.msrb.mxu2 %v2429_v28  ;;  %808 = vmatpush.msra.mxu3 %v2430_v59 }
 0x111   :  { %716 = vmatpush.msrb.mxu1 %v2431_v34 }
 0x112   :  { %789 = vmatpush.msrb.mxu2 %v2432_v47  ;;  %809 = vmatpush.msra.mxu3 %v2433_v52  ;;  %v2447_v47 = vld [vmem:[#allocation27_spill] sm:$0xff] }
 0x113   :  { %v179_v25 = vadd.f32 %v178_v61, %v2447_v47 }
 0x114   :  { %v2093_v57 = vpop.f32.mrf.mxu1 }
 0x115   :  { %2444 = vst [vmem:[#allocation39_spill] sm:$0xff] %v2093_v57 }
 0x16f   :  { %v452_v46 = vpop.f32.mrf.mxu1 }
 0x170   :  { %v495_v52 = vadd.f32 %v452_v46, %v2446_v6 }
 0x172   :  { %v1334_v63 = vmul.f32 -1.442695, %v495_v52 }
 0x174   :  { %1369 = vpow2.f32 %v1334_v63 }
 0x175   :  { %v472_v8 = vpop.f32.mrf.mxu2 }
 0x176   :  { %v515_v34 = vadd.f32 %v472_v8, %v179_v25  ;;  %v492_v61 = vpop.f32.mrf.mxu3 }
 0x177   :  { %v535_v8 = vadd.f32 %v2014_v16, %v492_v61 }
 0x178   :  { %v1335_v32 = vmul.f32 -1.442695, %v515_v34 }
 0x17a   :  { %v1370_v59 = vpop.eup %1369  ;;  %1371 = vpow2.f32 %v1335_v32 }
 0x17b   :  { %v499_v62 = vadd.f32 1.0, %v1370_v59 }
 0x17d   :  { %1373 = vrcp.f32 %v499_v62  ;;  %v511_v44 = vand.u32 2147483648, %v499_v62  ;;  %v509_v52 = vand.u32 2147483647, %v499_v62  ;;  %vm505_vm11 = vweird.f32 %v499_v62 }
 0x17f   :  { %v512_v34 = vor.u32 1.1754944e-38, %v511_v44  ;;  %vm510_vm13 = vcmp.eq.f32.partialorder %v509_v52, 8.507059e+37 }
 0x180   :  { %v1372_v35 = vpop.eup %1371 }
 0x181   :  { %v519_v2 = vadd.f32 1.0, %v1372_v35  ;;  %v220_v35 = vadd.f32 %v219_v30, %v2017_v39 }
 0x183   :  { %v1374_v28 = vpop.eup %1373  ;;  %1375 = vrcp.f32 %v519_v2  ;;  %v531_v41 = vand.u32 2147483648, %v519_v2  ;;  %vm525_vm15 = vweird.f32 %v519_v2 }
 0x184   :  { %v501_v57 = vmul.f32 %v1374_v28, %v499_v62  ;;  %vm506_vm10 = vweird.f32 %v1374_v28 }
 0x185   :  { %vm507_vm12 = vmor %vm505_vm11, %vm506_vm10 }
 0x186   :  { %v502_v60 = vsub.f32 1.0, %v501_v57 }
 0x188   :  { %v503_v58 = vmul.f32 %v1374_v28, %v502_v60 }
 0x189   :  { %v1376_v46 = vpop.eup %1375 }
 0x18a   :  { %v521_v6 = vmul.f32 %v1376_v46, %v519_v2  ;;  %v504_v63 = vadd.f32 %v1374_v28, %v503_v58  ;;  %vm526_vm14 = vweird.f32 %v1376_v46  ;;  %v529_v58 = vand.u32 2147483647, %v519_v2 }
 0x18b   :  { %vm527_vm0 = vmor %vm525_vm15, %vm526_vm14 }
 0x18c   :  { %v522_v25 = vsub.f32 1.0, %v521_v6  ;;  %v508_v59 = vsel %vm507_vm12, %v1374_v28, %v504_v63  ;;  %v532_v6 = vor.u32 1.1754944e-38, %v531_v41  ;;  %vm530_vm1 = vcmp.eq.f32.partialorder %v529_v58, 8.507059e+37 }
 0x18d   :  { %v513_v32 = vsel %vm510_vm13, %v512_v34, %v508_v59 }
 0x18e   :  { %v536_v57 = vmul.f32 %v535_v8, %v513_v32  ;;  %v523_v47 = vmul.f32 %v1376_v46, %v522_v25 }
 0x190   :  { %v537_v60 = vadd.f32 %v536_v57, %v220_v35  ;;  %v524_v26 = vadd.f32 %v1376_v46, %v523_v47  ;;  %v2460_v35 = vld [vmem:[#allocation30_spill] sm:$0xff] }
 0x191   :  { %v223_v57 = vadd.f32 %v2460_v35, %v2017_v39 }
 0x192   :  { %1377 = vtanh.f32 %v537_v60  ;;  %v528_v62 = vsel %vm527_vm0, %v1376_v46, %v524_v26 }
 0x193   :  { %v533_v52 = vsel %vm530_vm1, %v532_v6, %v528_v62 }
 0x198   :  { %v1378_v44 = vpop.eup %1377 }
 0x199   :  { %v539_v28 = vsub.f32 %v2020_v43, %v1378_v44 }
 0x19b   :  { %v540_v61 = vmul.f32 %v539_v28, %v533_v52 }
 0x19d   :  { %v2102_v63 = vadd.f32 %v1378_v44, %v540_v61 }
 0x19f   :  { %564 = vmatmul.f32.vlgmr.msra.gmra.mxu0 %v2102_v63  ;;  %584 = vmatmul.f32.vlgmr.msra.gmra.mxu1 %v2102_v63 }
 0x1a0   :  { %604 = vmatmul.f32.vlgmr.msra.gmra.mxu2 %v2102_v63  ;;  %814 = vmatpush.msra.mxu0 %v1649_v9  ;;  %v2454_v9 = vld [vmem:[#allocation17_spill] sm:$0xff] }
 0x1a1   :  { %887 = vmatpush.msra.mxu1 %v1624_v0  ;;  %907 = vmatpush.msra.mxu2 %v1730_v33  ;;  %v2448_v0 = vld [vmem:[#allocation15_spill] sm:$0xff] }
 0x1a2   :  { %815 = vmatpush.msra.mxu0 %v1657_v11  ;;  %v2456_v11 = vld [vmem:[#allocation20_spill] sm:$0xff] }
 0x1a3   :  { %888 = vmatpush.msra.mxu1 %v1626_v1  ;;  %908 = vmatpush.msra.mxu2 %v1740_v36  ;;  %v2449_v1 = vld [vmem:[#allocation12_spill] sm:$0xff] }
 0x1a4   :  { %816 = vmatpush.msra.mxu0 %v1663_v13  ;;  %v2458_v13 = vld [vmem:[#allocation29_spill] sm:$0xff] }
 0x1a5   :  { %889 = vmatpush.msra.mxu1 %v1632_v3  ;;  %909 = vmatpush.msra.mxu2 %v1746_v38  ;;  %v2450_v3 = vld [vmem:[#allocation18_spill] sm:$0xff] }
 0x1a6   :  { %817 = vmatpush.msra.mxu0 %v1669_v15 }
 0x1a7   :  { %890 = vmatpush.msra.mxu1 %v1635_v4  ;;  %910 = vmatpush.msra.mxu2 %v1756_v42  ;;  %v2451_v4 = vld [vmem:[#allocation16_spill] sm:$0xff] }
 0x1a8   :  { %818 = vmatpush.msra.mxu0 %v1680_v18  ;;  %v2459_v18 = vld [vmem:[#allocation22_spill] sm:$0xff] }
 0x1a9   :  { %891 = vmatpush.msra.mxu1 %v1638_v5  ;;  %911 = vmatpush.msra.mxu2 %v1765_v45  ;;  %v2452_v5 = vld [vmem:[#allocation13_spill] sm:$0xff] }
 0x1aa   :  { %819 = vmatpush.msra.mxu0 %v1688_v20 }
 0x1ab   :  { %892 = vmatpush.msra.mxu1 %v1646_v7  ;;  %912 = vmatpush.msra.mxu2 %v1779_v48  ;;  %v2453_v7 = vld [vmem:[#allocation19_spill] sm:$0xff] }
 0x1ac   :  { %820 = vmatpush.msra.mxu0 %v1694_v22 }
 0x1ad   :  { %893 = vmatpush.msra.mxu1 %v1652_v10  ;;  %913 = vmatpush.msra.mxu2 %v1785_v49  ;;  %v2455_v10 = vld [vmem:[#allocation14_spill] sm:$0xff] }
 0x1ae   :  { %821 = vmatpush.msra.mxu0 %v1700_v24 }
 0x1af   :  { %894 = vmatpush.msra.mxu1 %v1659_v12  ;;  %914 = vmatpush.msra.mxu2 %v1792_v50  ;;  %v2457_v12 = vld [vmem:[#allocation27_spill] sm:$0xff] }
 0x1b0   :  { %822 = vmatpush.msra.mxu0 %v1711_v27 }
 0x1b1   :  { %895 = vmatpush.msra.mxu1 %v1665_v14  ;;  %915 = vmatpush.msra.mxu2 %v1799_v51  ;;  %v182_v14 = vadd.f32 %v2458_v13, %v2457_v12  ;;  %v2170_v13 = vld [vmem:[#allocation3 + $0x168] sm:$0xff] }
 0x1b2   :  { %823 = vmatpush.msra.mxu0 %v1719_v29 }
 0x1b3   :  { %896 = vmatpush.msra.mxu1 %v1676_v17  ;;  %916 = vmatpush.msra.mxu2 %v1811_v53 }
 0x1b4   :  { %824 = vmatpush.msra.mxu0 %v1725_v31 }
 0x1b5   :  { %897 = vmatpush.msra.mxu1 %v1682_v19  ;;  %917 = vmatpush.msra.mxu2 %v1817_v54 }
 0x1b6   :  { %825 = vmatpush.msra.mxu0 %v1743_v37 }
 0x1b7   :  { %898 = vmatpush.msra.mxu1 %v1690_v21  ;;  %918 = vmatpush.msra.mxu2 %v1824_v55 }
 0x1b8   :  { %826 = vmatpush.msra.mxu0 %v1752_v40 }
 0x1b9   :  { %899 = vmatpush.msra.mxu1 %v1696_v23  ;;  %919 = vmatpush.msra.mxu2 %v1831_v56 }
 0x1ba   :  { %827 = vmatpush.msra.mxu0 %v2448_v0 }
 0x1bb   :  { %900 = vmatpush.msra.mxu1 %v2449_v1  ;;  %920 = vmatpush.msra.mxu2 %v2450_v3 }
 0x1bc   :  { %828 = vmatpush.msra.mxu0 %v2451_v4 }
 0x1bd   :  { %901 = vmatpush.msra.mxu1 %v2452_v5  ;;  %921 = vmatpush.msra.mxu2 %v2453_v7 }
 0x1be   :  { %829 = vmatpush.msra.mxu0 %v2454_v9 }
 0x1bf   :  { %902 = vmatpush.msra.mxu1 %v2455_v10  ;;  %922 = vmatpush.msra.mxu2 %v2456_v11  ;;  %v2167_v10 = vld [vmem:[#allocation3 + $0x178] sm:$0xff] }
 0x21c   :  { %v565_v15 = vpop.f32.mrf.mxu0  ;;  %v585_v17 = vpop.f32.mrf.mxu1 }
 0x21d   :  { %v608_v19 = vadd.f32 %v565_v15, %v2459_v18  ;;  %v628_v20 = vadd.f32 %v585_v17, %v182_v14  ;;  %v2177_v14 = vld [vmem:[#allocation3 + $0x150] sm:$0xff]  ;;  %v2181_v15 = vld [vmem:[#allocation3 + $0x148] sm:$0xff]  ;;  %v2184_v17 = vld [vmem:[#allocation3 + $0x138] sm:$0xff] }
 0x21e   :  { %v2191_v18 = vld [vmem:[#allocation3 + $0x120] sm:$0xff] }
 0x21f   :  { %v1336_v21 = vmul.f32 -1.442695, %v608_v19  ;;  %v1337_v22 = vmul.f32 -1.442695, %v628_v20  ;;  %v2198_v19 = vld [vmem:[#allocation3 + $0x108] sm:$0xff]  ;;  %v2205_v20 = vld [vmem:[#allocation3 + $0xf0] sm:$0xff] }
 0x221   :  { %1379 = vpow2.f32 %v1336_v21  ;;  %v2212_v21 = vld [vmem:[#allocation3 + $0xd8] sm:$0xff] }
 0x222   :  { %1381 = vpow2.f32 %v1337_v22  ;;  %v2219_v22 = vld [vmem:[#allocation3 + $0xc0] sm:$0xff] }
 0x223   :  { %v605_v2 = vpop.f32.mrf.mxu2 }
 0x224   :  { %v648_v8 = vadd.f32 %v2014_v16, %v605_v2 }
 0x227   :  { %v1380_v23 = vpop.eup %1379 }
 0x228   :  { %v1382_v24 = vpop.eup %1381  ;;  %v612_v26 = vadd.f32 1.0, %v1380_v23  ;;  %v2226_v23 = vld [vmem:[#allocation3 + $0xa8] sm:$0xff] }
 0x229   :  { %v632_v27 = vadd.f32 1.0, %v1382_v24  ;;  %v2233_v24 = vld [vmem:[#allocation3 + $0x90] sm:$0xff] }
 0x22a   :  { %1383 = vrcp.f32 %v612_v26  ;;  %v624_v43 = vand.u32 2147483648, %v612_v26  ;;  %v622_v30 = vand.u32 2147483647, %v612_v26  ;;  %vm618_vm3 = vweird.f32 %v612_v26 }
 0x22b   :  { %1385 = vrcp.f32 %v632_v27  ;;  %v644_v6 = vand.u32 2147483648, %v632_v27  ;;  %vm638_vm7 = vweird.f32 %v632_v27  ;;  %v642_v28 = vand.u32 2147483647, %v632_v27 }
 0x22c   :  { %v625_v25 = vor.u32 1.1754944e-38, %v624_v43  ;;  %vm623_vm5 = vcmp.eq.f32.partialorder %v622_v30, 8.507059e+37 }
 0x22d   :  { %v645_v0 = vor.u32 1.1754944e-38, %v644_v6  ;;  %vm643_vm9 = vcmp.eq.f32.partialorder %v642_v28, 8.507059e+37 }
 0x230   :  { %v1384_v29 = vpop.eup %1383 }
 0x231   :  { %v1386_v31 = vpop.eup %1385  ;;  %v614_v37 = vmul.f32 %v1384_v29, %v612_v26  ;;  %vm619_vm2 = vweird.f32 %v1384_v29  ;;  %v2240_v26 = vld [vmem:[#allocation3 + $0x78] sm:$0xff] }
 0x232   :  { %v634_v41 = vmul.f32 %v1386_v31, %v632_v27  ;;  %vm620_vm4 = vmor %vm618_vm3, %vm619_vm2  ;;  %vm639_vm6 = vweird.f32 %v1386_v31  ;;  %v2247_v27 = vld [vmem:[#allocation3 + $0x60] sm:$0xff] }
 0x233   :  { %v615_v40 = vsub.f32 1.0, %v614_v37  ;;  %vm640_vm8 = vmor %vm638_vm7, %vm639_vm6  ;;  %v2268_v37 = vld [vmem:[#allocation3 + $0x18] sm:$0xff] }
 0x234   :  { %v635_v34 = vsub.f32 1.0, %v634_v41 }
 0x235   :  { %v616_v47 = vmul.f32 %v1384_v29, %v615_v40  ;;  %v2275_v40 = vld [vmem:[#allocation3] sm:$0xff] }
 0x236   :  { %v636_v58 = vmul.f32 %v1386_v31, %v635_v34 }
 0x237   :  { %v617_v46 = vadd.f32 %v1384_v29, %v616_v47 }
 0x238   :  { %v637_v44 = vadd.f32 %v1386_v31, %v636_v58 }
 0x239   :  { %v621_v59 = vsel %vm620_vm4, %v1384_v29, %v617_v46  ;;  %v2254_v29 = vld [vmem:[#allocation3 + $0x48] sm:$0xff]  ;;  %v2462_v46 = vld [vmem:[#allocation23_spill] sm:$0xff] }
 0x23a   :  { %v626_v32 = vsel %vm623_vm5, %v625_v25, %v621_v59  ;;  %v641_v52 = vsel %vm640_vm8, %v1386_v31, %v637_v44  ;;  %v2261_v31 = vld [vmem:[#allocation3 + $0x30] sm:$0xff] }
 0x23b   :  { %v649_v60 = vmul.f32 %v648_v8, %v626_v32  ;;  %v646_v4 = vsel %vm643_vm9, %v645_v0, %v641_v52 }
 0x23d   :  { %v650_v62 = vadd.f32 %v649_v60, %v223_v57 }
 0x23f   :  { %1387 = vtanh.f32 %v650_v62 }
 0x245   :  { %v1388_v61 = vpop.eup %1387 }
 0x246   :  { %v652_v1 = vsub.f32 %v2102_v63, %v1388_v61  ;;  %v2174_v63 = vld [vmem:[#allocation3 + $0x160] sm:$0xff] }
 0x248   :  { %v653_v5 = vmul.f32 %v652_v1, %v646_v4 }
 0x24a   :  { %v2162_v9 = vadd.f32 %v1388_v61, %v653_v5 }
 0x24c   :  { %677 = vmatmul.f32.vlgmr.msrb.gmra.mxu3 %v2162_v9  ;;  %697 = vmatmul.f32.vlgmr.msrb.gmra.mxu0 %v2162_v9 }
 0x24d   :  { %717 = vmatmul.f32.vlgmr.msrb.gmra.mxu1 %v2162_v9  ;;  %927 = vmatpush.msrb.mxu3 %v2167_v10 }
 0x24e   :  { %1000 = vmatpush.msrb.mxu0 %v2170_v13  ;;  %1020 = vmatpush.msrb.mxu1 %v1730_v33  ;;  %v2188_v33 = vld [vmem:[#allocation3 + $0x130] sm:$0xff] }
 0x24f   :  { %928 = vmatpush.msrb.mxu3 %v2174_v63 }
 0x250   :  { %1001 = vmatpush.msrb.mxu0 %v2177_v14  ;;  %1021 = vmatpush.msrb.mxu1 %v1740_v36  ;;  %v2195_v36 = vld [vmem:[#allocation3 + $0x118] sm:$0xff] }
 0x251   :  { %929 = vmatpush.msrb.mxu3 %v2181_v15 }
 0x252   :  { %1002 = vmatpush.msrb.mxu0 %v2184_v17  ;;  %1022 = vmatpush.msrb.mxu1 %v1746_v38  ;;  %v2202_v38 = vld [vmem:[#allocation3 + $0x100] sm:$0xff] }
 0x253   :  { %930 = vmatpush.msrb.mxu3 %v2188_v33 }
 0x254   :  { %1003 = vmatpush.msrb.mxu0 %v2191_v18  ;;  %1023 = vmatpush.msrb.mxu1 %v1756_v42  ;;  %v2209_v42 = vld [vmem:[#allocation3 + $0xe8] sm:$0xff] }
 0x255   :  { %931 = vmatpush.msrb.mxu3 %v2195_v36 }
 0x256   :  { %1004 = vmatpush.msrb.mxu0 %v2198_v19  ;;  %1024 = vmatpush.msrb.mxu1 %v1765_v45  ;;  %v2216_v45 = vld [vmem:[#allocation3 + $0xd0] sm:$0xff] }
 0x257   :  { %932 = vmatpush.msrb.mxu3 %v2202_v38 }
 0x258   :  { %1005 = vmatpush.msrb.mxu0 %v2205_v20  ;;  %1025 = vmatpush.msrb.mxu1 %v1779_v48  ;;  %v2223_v48 = vld [vmem:[#allocation3 + $0xb8] sm:$0xff] }
 0x259   :  { %933 = vmatpush.msrb.mxu3 %v2209_v42 }
 0x25a   :  { %1006 = vmatpush.msrb.mxu0 %v2212_v21  ;;  %1026 = vmatpush.msrb.mxu1 %v1785_v49  ;;  %v2230_v49 = vld [vmem:[#allocation3 + $0xa0] sm:$0xff] }
 0x25b   :  { %934 = vmatpush.msrb.mxu3 %v2216_v45 }
 0x25c   :  { %1007 = vmatpush.msrb.mxu0 %v2219_v22  ;;  %1027 = vmatpush.msrb.mxu1 %v1792_v50  ;;  %v2237_v50 = vld [vmem:[#allocation3 + $0x88] sm:$0xff] }
 0x25d   :  { %935 = vmatpush.msrb.mxu3 %v2223_v48 }
 0x25e   :  { %1008 = vmatpush.msrb.mxu0 %v2226_v23  ;;  %1028 = vmatpush.msrb.mxu1 %v1799_v51  ;;  %v2244_v51 = vld [vmem:[#allocation3 + $0x70] sm:$0xff] }
 0x25f   :  { %936 = vmatpush.msrb.mxu3 %v2230_v49 }
 0x260   :  { %1009 = vmatpush.msrb.mxu0 %v2233_v24  ;;  %1029 = vmatpush.msrb.mxu1 %v1811_v53  ;;  %v2251_v53 = vld [vmem:[#allocation3 + $0x58] sm:$0xff] }
 0x261   :  { %937 = vmatpush.msrb.mxu3 %v2237_v50 }
 0x262   :  { %1010 = vmatpush.msrb.mxu0 %v2240_v26  ;;  %1030 = vmatpush.msrb.mxu1 %v1817_v54  ;;  %v2258_v54 = vld [vmem:[#allocation3 + $0x40] sm:$0xff] }
 0x263   :  { %938 = vmatpush.msrb.mxu3 %v2244_v51 }
 0x264   :  { %1011 = vmatpush.msrb.mxu0 %v2247_v27  ;;  %1031 = vmatpush.msrb.mxu1 %v1824_v55  ;;  %v2265_v55 = vld [vmem:[#allocation3 + $0x28] sm:$0xff] }
 0x265   :  { %939 = vmatpush.msrb.mxu3 %v2251_v53 }
 0x266   :  { %1012 = vmatpush.msrb.mxu0 %v2254_v29  ;;  %1032 = vmatpush.msrb.mxu1 %v1831_v56  ;;  %v2272_v56 = vld [vmem:[#allocation3 + $0x10] sm:$0xff] }
 0x267   :  { %940 = vmatpush.msrb.mxu3 %v2258_v54 }
 0x268   :  { %1013 = vmatpush.msrb.mxu0 %v2261_v31  ;;  %1033 = vmatpush.msrb.mxu1 %v2450_v3  ;;  %v2461_v3 = vld [vmem:[#allocation31_spill] sm:$0xff] }
 0x269   :  { %941 = vmatpush.msrb.mxu3 %v2265_v55  ;;  %v185_v41 = vadd.f32 %v2461_v3, %v2457_v12  ;;  %v2463_v3 = vld [vmem:[#allocation32_spill] sm:$0xff] }
 0x26a   :  { %1014 = vmatpush.msrb.mxu0 %v2268_v37  ;;  %1034 = vmatpush.msrb.mxu1 %v2453_v7 }
 0x26b   :  { %942 = vmatpush.msrb.mxu3 %v2272_v56 }
 0x26c   :  { %1015 = vmatpush.msrb.mxu0 %v2275_v40  ;;  %1035 = vmatpush.msrb.mxu1 %v2456_v11 }
 0x2c9   :  { %v698_v43 = vpop.f32.mrf.mxu0 }
 0x2ca   :  { %v741_v47 = vadd.f32 %v698_v43, %v185_v41  ;;  %v718_v28 = vpop.f32.mrf.mxu1  ;;  %v226_v41 = vadd.f32 %v2463_v3, %v2017_v39 }
 0x2cb   :  { %v761_v1 = vadd.f32 %v2014_v16, %v718_v28 }
 0x2cc   :  { %v1339_v30 = vmul.f32 -1.442695, %v741_v47 }
 0x2ce   :  { %1389 = vpow2.f32 %v1339_v30 }
 0x2cf   :  { %v678_v2 = vpop.f32.mrf.mxu3 }
 0x2d0   :  { %v721_v34 = vadd.f32 %v678_v2, %v2462_v46 }
 0x2d2   :  { %v1338_v7 = vmul.f32 -1.442695, %v721_v34 }
 0x2d4   :  { %1391 = vpow2.f32 %v1338_v7  ;;  %v1390_v25 = vpop.eup %1389 }
 0x2d5   :  { %v745_v8 = vadd.f32 1.0, %v1390_v25 }
 0x2d7   :  { %v757_v46 = vand.u32 2147483648, %v745_v8  ;;  %vm751_vm15 = vweird.f32 %v745_v8  ;;  %v755_v34 = vand.u32 2147483647, %v745_v8 }
 0x2d9   :  { %vm756_vm1 = vcmp.eq.f32.partialorder %v755_v34, 8.507059e+37 }
 0x2da   :  { %v1392_v59 = vpop.eup %1391 }
 0x2db   :  { %v725_v32 = vadd.f32 1.0, %v1392_v59  ;;  %v758_v59 = vor.u32 1.1754944e-38, %v757_v46 }
 0x2dd   :  { %1393 = vrcp.f32 %v725_v32  ;;  %v737_v62 = vand.u32 2147483648, %v725_v32  ;;  %v735_v6 = vand.u32 2147483647, %v725_v32  ;;  %vm731_vm11 = vweird.f32 %v725_v32 }
 0x2de   :  { %1395 = vrcp.f32 %v745_v8 }
 0x2df   :  { %v738_v0 = vor.u32 1.1754944e-38, %v737_v62  ;;  %vm736_vm13 = vcmp.eq.f32.partialorder %v735_v6, 8.507059e+37 }
 0x2e3   :  { %v1394_v35 = vpop.eup %1393 }
 0x2e4   :  { %v1396_v11 = vpop.eup %1395  ;;  %v727_v57 = vmul.f32 %v1394_v35, %v725_v32  ;;  %vm732_vm10 = vweird.f32 %v1394_v35 }
 0x2e5   :  { %v747_v58 = vmul.f32 %v1396_v11, %v745_v8  ;;  %vm733_vm12 = vmor %vm731_vm11, %vm732_vm10  ;;  %vm752_vm14 = vweird.f32 %v1396_v11  ;;  %v1475_v8 = vld [vmem:[#allocation3 + $0x170] sm:$0xff] }
 0x2e6   :  { %v728_v60 = vsub.f32 1.0, %v727_v57  ;;  %vm753_vm0 = vmor %vm751_vm15, %vm752_vm14 }
 0x2e7   :  { %v748_v61 = vsub.f32 1.0, %v747_v58  ;;  %v1478_v58 = vld [vmem:[#allocation3 + $0x128] sm:$0xff] }
 0x2e8   :  { %v729_v44 = vmul.f32 %v1394_v35, %v728_v60 }
 0x2e9   :  { %v749_v47 = vmul.f32 %v1396_v11, %v748_v61 }
 0x2ea   :  { %v730_v52 = vadd.f32 %v1394_v35, %v729_v44 }
 0x2eb   :  { %v750_v2 = vadd.f32 %v1396_v11, %v749_v47 }
 0x2ec   :  { %v734_v4 = vsel %vm733_vm12, %v1394_v35, %v730_v52 }
 0x2ed   :  { %v739_v5 = vsel %vm736_vm13, %v738_v0, %v734_v4  ;;  %v754_v7 = vsel %vm753_vm0, %v1396_v11, %v750_v2  ;;  %v1477_v11 = vld [vmem:[#allocation3 + $0x140] sm:$0xff] }
 0x2ee   :  { %v762_v43 = vmul.f32 %v761_v1, %v739_v5  ;;  %v759_v35 = vsel %vm756_vm1, %v758_v59, %v754_v7 }
 0x2f0   :  { %v763_v30 = vadd.f32 %v762_v43, %v226_v41 }
 0x2f2   :  { %1397 = vtanh.f32 %v763_v30 }
 0x2f8   :  { %v1398_v25 = vpop.eup %1397 }
 0x2f9   :  { %v765_v32 = vsub.f32 %v2162_v9, %v1398_v25  ;;  %v1476_v9 = vld [vmem:[#allocation3 + $0x158] sm:$0xff] }
 0x2fb   :  { %v766_v57 = vmul.f32 %v765_v32, %v759_v35 }
 0x2fd   :  { %v2286_v60 = vadd.f32 %v1398_v25, %v766_v57 }
 0x2ff   :  { %790 = vmatmul.f32.vlgmr.msrb.gmra.mxu2 %v2286_v60  ;;  %810 = vmatmul.f32.vlgmr.msra.gmra.mxu3 %v2286_v60 }
 0x300   :  { %830 = vmatmul.f32.vlgmr.msra.gmra.mxu0 %v2286_v60  ;;  %1040 = vmatpush.msrb.mxu2 %v2167_v10 }
 0x301   :  { %1113 = vmatpush.msra.mxu3 %v2170_v13  ;;  %1133 = vmatpush.msra.mxu0 %v1475_v8  ;;  %v1479_v13 = vld [vmem:[#allocation3 + $0x110] sm:$0xff]  ;;  %v2466_v8 = vld [vmem:[#allocation34_spill] sm:$0xff] }
 0x302   :  { %1041 = vmatpush.msrb.mxu2 %v2174_v63 }
 0x303   :  { %1114 = vmatpush.msra.mxu3 %v2177_v14  ;;  %1134 = vmatpush.msra.mxu0 %v1476_v9  ;;  %v1480_v14 = vld [vmem:[#allocation3 + $0xf8] sm:$0xff]  ;;  %v229_v9 = vadd.f32 %v2466_v8, %v2017_v39 }
 0x304   :  { %1042 = vmatpush.msrb.mxu2 %v2181_v15 }
 0x305   :  { %1115 = vmatpush.msra.mxu3 %v2184_v17  ;;  %1135 = vmatpush.msra.mxu0 %v1477_v11  ;;  %v1481_v17 = vld [vmem:[#allocation3 + $0xe0] sm:$0xff] }
 0x306   :  { %1043 = vmatpush.msrb.mxu2 %v2188_v33 }
 0x307   :  { %1116 = vmatpush.msra.mxu3 %v2191_v18  ;;  %1136 = vmatpush.msra.mxu0 %v1478_v58  ;;  %v1482_v18 = vld [vmem:[#allocation3 + $0xc8] sm:$0xff] }
 0x308   :  { %1044 = vmatpush.msrb.mxu2 %v2195_v36 }
 0x309   :  { %1117 = vmatpush.msra.mxu3 %v2198_v19  ;;  %1137 = vmatpush.msra.mxu0 %v1479_v13  ;;  %v1483_v19 = vld [vmem:[#allocation3 + $0xb0] sm:$0xff] }
 0x30a   :  { %1045 = vmatpush.msrb.mxu2 %v2202_v38 }
 0x30b   :  { %1118 = vmatpush.msra.mxu3 %v2205_v20  ;;  %1138 = vmatpush.msra.mxu0 %v1480_v14  ;;  %v1484_v20 = vld [vmem:[#allocation3 + $0x98] sm:$0xff] }
 0x30c   :  { %1046 = vmatpush.msrb.mxu2 %v2209_v42 }
 0x30d   :  { %1119 = vmatpush.msra.mxu3 %v2212_v21  ;;  %1139 = vmatpush.msra.mxu0 %v1481_v17  ;;  %v1485_v21 = vld [vmem:[#allocation3 + $0x80] sm:$0xff] }
 0x30e   :  { %1047 = vmatpush.msrb.mxu2 %v2216_v45 }
 0x30f   :  { %1120 = vmatpush.msra.mxu3 %v2219_v22  ;;  %1140 = vmatpush.msra.mxu0 %v1482_v18  ;;  %v1486_v22 = vld [vmem:[#allocation3 + $0x68] sm:$0xff] }
 0x310   :  { %1048 = vmatpush.msrb.mxu2 %v2223_v48 }
 0x311   :  { %1121 = vmatpush.msra.mxu3 %v2226_v23  ;;  %1141 = vmatpush.msra.mxu0 %v1483_v19  ;;  %v1487_v23 = vld [vmem:[#allocation3 + $0x50] sm:$0xff] }
 0x312   :  { %1049 = vmatpush.msrb.mxu2 %v2230_v49 }
 0x313   :  { %1122 = vmatpush.msra.mxu3 %v2233_v24  ;;  %1142 = vmatpush.msra.mxu0 %v1484_v20  ;;  %v1488_v24 = vld [vmem:[#allocation3 + $0x38] sm:$0xff] }
 0x314   :  { %1050 = vmatpush.msrb.mxu2 %v2237_v50 }
 0x315   :  { %1123 = vmatpush.msra.mxu3 %v2240_v26  ;;  %1143 = vmatpush.msra.mxu0 %v1485_v21  ;;  %v1489_v26 = vld [vmem:[#allocation3 + $0x20] sm:$0xff] }
 0x316   :  { %1051 = vmatpush.msrb.mxu2 %v2244_v51 }
 0x317   :  { %1124 = vmatpush.msra.mxu3 %v2247_v27  ;;  %1144 = vmatpush.msra.mxu0 %v1486_v22  ;;  %v1490_v27 = vld [vmem:[#allocation3 + $0x8] sm:$0xff] }
 0x318   :  { %1052 = vmatpush.msrb.mxu2 %v2251_v53 }
 0x319   :  { %1125 = vmatpush.msra.mxu3 %v2254_v29  ;;  %1145 = vmatpush.msra.mxu0 %v1487_v23  ;;  %v2464_v29 = vld [vmem:[#allocation33_spill] sm:$0xff] }
 0x31a   :  { %1053 = vmatpush.msrb.mxu2 %v2258_v54  ;;  %v188_v62 = vadd.f32 %v2464_v29, %v2457_v12 }
 0x31b   :  { %1126 = vmatpush.msra.mxu3 %v2261_v31  ;;  %1146 = vmatpush.msra.mxu0 %v1488_v24  ;;  %v2465_v31 = vld [vmem:[#allocation24_spill] sm:$0xff] }
 0x31c   :  { %1054 = vmatpush.msrb.mxu2 %v2265_v55 }
 0x31d   :  { %1127 = vmatpush.msra.mxu3 %v2268_v37  ;;  %1147 = vmatpush.msra.mxu0 %v1489_v26 }
 0x31e   :  { %1055 = vmatpush.msrb.mxu2 %v2272_v56 }
 0x31f   :  { %1128 = vmatpush.msra.mxu3 %v2275_v40  ;;  %1148 = vmatpush.msra.mxu0 %v1490_v27 }
 0x37d   :  { %v831_v34 = vpop.f32.mrf.mxu0 }
 0x37e   :  { %v874_v32 = vadd.f32 %v2014_v16, %v831_v34 }
 0x382   :  { %v791_v44 = vpop.f32.mrf.mxu2  ;;  %v811_v6 = vpop.f32.mrf.mxu3 }
 0x383   :  { %v834_v28 = vadd.f32 %v791_v44, %v2465_v31  ;;  %v854_v52 = vadd.f32 %v811_v6, %v188_v62 }
 0x385   :  { %v1340_v61 = vmul.f32 -1.442695, %v834_v28  ;;  %v1341_v0 = vmul.f32 -1.442695, %v854_v52 }
 0x387   :  { %1399 = vpow2.f32 %v1340_v61  ;;  %v2357_v61 = vld [vmem:[%s2391_s4] ss:$0 sm:$0xff] }
 0x388   :  { %1401 = vpow2.f32 %v1341_v0 }
 0x38d   :  { %v1400_v37 = vpop.eup %1399 }
 0x38e   :  { %v1402_v1 = vpop.eup %1401  ;;  %v838_v4 = vadd.f32 1.0, %v1400_v37 }
 0x38f   :  { %v858_v5 = vadd.f32 1.0, %v1402_v1  ;;  %v2469_v1 = vld [vmem:[#allocation36_spill] sm:$0xff] }
 0x390   :  { %1403 = vrcp.f32 %v838_v4  ;;  %v850_v47 = vand.u32 2147483648, %v838_v4  ;;  %v848_v46 = vand.u32 2147483647, %v838_v4  ;;  %vm844_vm3 = vweird.f32 %v838_v4 }
 0x391   :  { %1405 = vrcp.f32 %v858_v5  ;;  %v870_v17 = vand.u32 2147483648, %v858_v5  ;;  %vm864_vm7 = vweird.f32 %v858_v5  ;;  %v868_v18 = vand.u32 2147483647, %v858_v5 }
 0x392   :  { %v851_v25 = vor.u32 1.1754944e-38, %v850_v47  ;;  %vm849_vm5 = vcmp.eq.f32.partialorder %v848_v46, 8.507059e+37 }
 0x393   :  { %v871_v21 = vor.u32 1.1754944e-38, %v870_v17  ;;  %vm869_vm9 = vcmp.eq.f32.partialorder %v868_v18, 8.507059e+37 }
 0x396   :  { %v1404_v40 = vpop.eup %1403 }
 0x397   :  { %v1406_v3 = vpop.eup %1405  ;;  %v840_v41 = vmul.f32 %v1404_v40, %v838_v4  ;;  %vm845_vm2 = vweird.f32 %v1404_v40  ;;  %v232_v4 = vadd.f32 %v2469_v1, %v2017_v39 }
 0x398   :  { %v860_v30 = vmul.f32 %v1406_v3, %v858_v5  ;;  %vm846_vm4 = vmor %vm844_vm3, %vm845_vm2  ;;  %vm865_vm6 = vweird.f32 %v1406_v3 }
 0x399   :  { %v841_v43 = vsub.f32 1.0, %v840_v41  ;;  %vm866_vm8 = vmor %vm864_vm7, %vm865_vm6 }
 0x39a   :  { %v861_v59 = vsub.f32 1.0, %v860_v30 }
 0x39b   :  { %v842_v2 = vmul.f32 %v1404_v40, %v841_v43 }
 0x39c   :  { %v862_v58 = vmul.f32 %v1406_v3, %v861_v59 }
 0x39d   :  { %v843_v7 = vadd.f32 %v1404_v40, %v842_v2 }
 0x39e   :  { %v863_v14 = vadd.f32 %v1406_v3, %v862_v58 }
 0x39f   :  { %v847_v35 = vsel %vm846_vm4, %v1404_v40, %v843_v7 }
 0x3a0   :  { %v852_v57 = vsel %vm849_vm5, %v851_v25, %v847_v35  ;;  %v867_v19 = vsel %vm866_vm8, %v1406_v3, %v863_v14 }
 0x3a1   :  { %v875_v11 = vmul.f32 %v874_v32, %v852_v57  ;;  %v872_v22 = vsel %vm869_vm9, %v871_v21, %v867_v19  ;;  %v2470_v32 = vld [vmem:[#allocation37_spill] sm:$0xff] }
 0x3a2   :  { %v194_v35 = vadd.f32 %v2470_v32, %v2457_v12  ;;  %v1248_v32 = vld [vmem:[#allocation6 + $0x48] sm:$0xff] }
 0x3a3   :  { %v876_v13 = vadd.f32 %v875_v11, %v229_v9  ;;  %v2471_v9 = vld [vmem:[#allocation26_spill] sm:$0xff] }
 0x3a5   :  { %1407 = vtanh.f32 %v876_v13 }
 0x3ab   :  { %v1408_v20 = vpop.eup %1407 }
 0x3ac   :  { %v878_v16 = vsub.f32 %v2286_v60, %v1408_v20 }
 0x3ae   :  { %v879_v23 = vmul.f32 %v878_v16, %v872_v22 }
 0x3b0   :  { %v2330_v24 = vadd.f32 %v1408_v20, %v879_v23 }
 0x3b2   :  { %903 = vmatmul.f32.vlgmr.msra.gmra.mxu1 %v2330_v24  ;;  %923 = vmatmul.f32.vlgmr.msra.gmra.mxu2 %v2330_v24 }
 0x3b3   :  { %943 = vmatmul.f32.vlgmr.msrb.gmra.mxu3 %v2330_v24  ;;  %1153 = vmatpush.msra.mxu1 %v2167_v10 }
 0x3b5   :  { %1154 = vmatpush.msra.mxu1 %v2174_v63  ;;  %v2467_v63 = vld [vmem:[#allocation25_spill] sm:$0xff] }
 0x3b7   :  { %1155 = vmatpush.msra.mxu1 %v2181_v15 }
 0x3b9   :  { %1156 = vmatpush.msra.mxu1 %v2188_v33 }
 0x3bb   :  { %1157 = vmatpush.msra.mxu1 %v2195_v36  ;;  %v2468_v36 = vld [vmem:[#allocation35_spill] sm:$0xff] }
 0x3bd   :  { %1158 = vmatpush.msra.mxu1 %v2202_v38  ;;  %v191_v38 = vadd.f32 %v2468_v36, %v2457_v12 }
 0x3bf   :  { %1159 = vmatpush.msra.mxu1 %v2209_v42 }
 0x3c1   :  { %1160 = vmatpush.msra.mxu1 %v2216_v45 }
 0x3c3   :  { %1161 = vmatpush.msra.mxu1 %v2223_v48 }
 0x3c5   :  { %1162 = vmatpush.msra.mxu1 %v2230_v49 }
 0x3c7   :  { %1163 = vmatpush.msra.mxu1 %v2237_v50 }
 0x3c9   :  { %1164 = vmatpush.msra.mxu1 %v2244_v51 }
 0x3cb   :  { %1165 = vmatpush.msra.mxu1 %v2251_v53 }
 0x3cd   :  { %1166 = vmatpush.msra.mxu1 %v2258_v54 }
 0x3cf   :  { %1167 = vmatpush.msra.mxu1 %v2265_v55 }
 0x3d1   :  { %1168 = vmatpush.msra.mxu1 %v2272_v56 }
 0x42f   :  { %v904_v10 = vpop.f32.mrf.mxu1 }
 0x430   :  { %v947_v15 = vadd.f32 %v904_v10, %v2467_v63 }
 0x432   :  { %v1342_v33 = vmul.f32 -1.442695, %v947_v15 }
 0x434   :  { %1409 = vpow2.f32 %v1342_v33 }
 0x435   :  { %v924_v42 = vpop.f32.mrf.mxu2 }
 0x436   :  { %v967_v45 = vadd.f32 %v924_v42, %v191_v38  ;;  %v944_v62 = vpop.f32.mrf.mxu3 }
 0x437   :  { %v987_v0 = vadd.f32 %v2357_v61, %v944_v62 }
 0x438   :  { %v1343_v48 = vmul.f32 -1.442695, %v967_v45 }
 0x43a   :  { %v1410_v49 = vpop.eup %1409  ;;  %1411 = vpow2.f32 %v1343_v48 }
 0x43b   :  { %v951_v50 = vadd.f32 1.0, %v1410_v49 }
 0x43d   :  { %1413 = vrcp.f32 %v951_v50  ;;  %v963_v60 = vand.u32 2147483648, %v951_v50  ;;  %v961_v27 = vand.u32 2147483647, %v951_v50  ;;  %vm957_vm11 = vweird.f32 %v951_v50 }
 0x43f   :  { %v964_v31 = vor.u32 1.1754944e-38, %v963_v60  ;;  %vm962_vm13 = vcmp.eq.f32.partialorder %v961_v27, 8.507059e+37 }
 0x440   :  { %v1412_v51 = vpop.eup %1411 }
 0x441   :  { %v971_v53 = vadd.f32 1.0, %v1412_v51 }
 0x443   :  { %v1414_v54 = vpop.eup %1413  ;;  %1415 = vrcp.f32 %v971_v53  ;;  %v983_v43 = vand.u32 2147483648, %v971_v53  ;;  %vm977_vm15 = vweird.f32 %v971_v53  ;;  %v981_v47 = vand.u32 2147483647, %v971_v53 }
 0x444   :  { %v953_v55 = vmul.f32 %v1414_v54, %v951_v50  ;;  %vm958_vm10 = vweird.f32 %v1414_v54  ;;  %v2472_v50 = vld [vmem:[#allocation38_spill] sm:$0xff] }
 0x445   :  { %vm959_vm12 = vmor %vm957_vm11, %vm958_vm10  ;;  %v984_v46 = vor.u32 1.1754944e-38, %v983_v43  ;;  %vm982_vm1 = vcmp.eq.f32.partialorder %v981_v47, 8.507059e+37  ;;  %v235_v51 = vadd.f32 %v2472_v50, %v2017_v39  ;;  %v1254_v43 = vld [vmem:[#allocation6 + $0x78] sm:$0xff]  ;;  %v1253_v47 = vld [vmem:[#allocation6 + $0x70] sm:$0xff] }
 0x446   :  { %v954_v56 = vsub.f32 1.0, %v953_v55  ;;  %1259 = vmatpush.msra.mxu2 %v1254_v43 }
 0x448   :  { %v955_v26 = vmul.f32 %v1414_v54, %v954_v56  ;;  %1260 = vmatpush.msra.mxu2 %v1253_v47 }
 0x449   :  { %v1416_v29 = vpop.eup %1415 }
 0x44a   :  { %v973_v44 = vmul.f32 %v1416_v29, %v971_v53  ;;  %v956_v6 = vadd.f32 %v1414_v54, %v955_v26  ;;  %vm978_vm14 = vweird.f32 %v1416_v29 }
 0x44b   :  { %vm979_vm0 = vmor %vm977_vm15, %vm978_vm14 }
 0x44c   :  { %v974_v28 = vsub.f32 1.0, %v973_v44  ;;  %v960_v52 = vsel %vm959_vm12, %v1414_v54, %v956_v6 }
 0x44d   :  { %v965_v37 = vsel %vm962_vm13, %v964_v31, %v960_v52  ;;  %v2473_v52 = vld [vmem:[#allocation39_spill] sm:$0xff] }
 0x44e   :  { %v988_v5 = vmul.f32 %v987_v0, %v965_v37  ;;  %v975_v40 = vmul.f32 %v1416_v29, %v974_v28  ;;  %v197_v0 = vadd.f32 %v2473_v52, %v2457_v12 }
 0x450   :  { %v989_v3 = vadd.f32 %v988_v5, %v232_v4  ;;  %v976_v41 = vadd.f32 %v1416_v29, %v975_v40  ;;  %v2474_v40 = vld [vmem:[#allocation28_spill] sm:$0xff] }
 0x452   :  { %1417 = vtanh.f32 %v989_v3  ;;  %v980_v30 = vsel %vm979_vm0, %v1416_v29, %v976_v41 }
 0x453   :  { %v985_v7 = vsel %vm982_vm1, %v984_v46, %v980_v30  ;;  %v1252_v30 = vld [vmem:[#allocation6 + $0x68] sm:$0xff] }
 0x454   :  { %1261 = vmatpush.msra.mxu2 %v1252_v30 }
 0x458   :  { %v1418_v2 = vpop.eup %1417 }
 0x459   :  { %v991_v34 = vsub.f32 %v2330_v24, %v1418_v2 }
 0x45b   :  { %v992_v25 = vmul.f32 %v991_v34, %v985_v7  ;;  %v1250_v34 = vld [vmem:[#allocation6 + $0x58] sm:$0xff] }
 0x45d   :  { %v993_v59 = vadd.f32 %v1418_v2, %v992_v25  ;;  %v1251_v2 = vld [vmem:[#allocation6 + $0x60] sm:$0xff]  ;;  %v1249_v25 = vld [vmem:[#allocation6 + $0x50] sm:$0xff] }
 0x45e   :  { %1262 = vmatpush.msra.mxu2 %v1251_v2 }
 0x45f   :  { %1016 = vmatmul.f32.vlgmr.msrb.gmra.mxu0 %v993_v59  ;;  %1036 = vmatmul.f32.vlgmr.msrb.gmra.mxu1 %v993_v59 }
 0x460   :  { %1056 = vmatmul.f32.vlgmr.msrb.gmra.mxu2 %v993_v59 }
 0x461   :  { %1263 = vmatpush.msra.mxu2 %v1250_v34 }
 0x463   :  { %1264 = vmatpush.msra.mxu2 %v1249_v25 }
 0x465   :  { %1265 = vmatpush.msra.mxu2 %v1248_v32 }
 0x4dc   :  { %v1017_v57 = vpop.f32.mrf.mxu0  ;;  %v1037_v8 = vpop.f32.mrf.mxu1 }
 0x4dd   :  { %v1060_v11 = vadd.f32 %v1017_v57, %v2471_v9  ;;  %v1080_v58 = vadd.f32 %v1037_v8, %v194_v35  ;;  %v1247_v35 = vld [vmem:[#allocation6 + $0x40] sm:$0xff]  ;;  %v1246_v57 = vld [vmem:[#allocation6 + $0x38] sm:$0xff]  ;;  %v1245_v8 = vld [vmem:[#allocation6 + $0x30] sm:$0xff] }
 0x4de   :  { %1266 = vmatpush.msra.mxu2 %v1247_v35 }
 0x4df   :  { %v1344_v13 = vmul.f32 -1.442695, %v1060_v11  ;;  %v1345_v14 = vmul.f32 -1.442695, %v1080_v58 }
 0x4e0   :  { %1267 = vmatpush.msra.mxu2 %v1246_v57 }
 0x4e1   :  { %1419 = vpow2.f32 %v1344_v13  ;;  %v1244_v13 = vld [vmem:[#allocation6 + $0x28] sm:$0xff] }
 0x4e2   :  { %1421 = vpow2.f32 %v1345_v14  ;;  %1268 = vmatpush.msra.mxu2 %v1245_v8 }
 0x4e3   :  { %v1057_v33 = vpop.f32.mrf.mxu2 }
 0x4e4   :  { %v1100_v48 = vadd.f32 %v2357_v61, %v1057_v33  ;;  %1269 = vmatpush.msra.mxu2 %v1244_v13 }
 0x4e7   :  { %v1420_v17 = vpop.eup %1419 }
 0x4e8   :  { %v1422_v18 = vpop.eup %1421  ;;  %v1064_v19 = vadd.f32 1.0, %v1420_v17  ;;  %v1243_v17 = vld [vmem:[#allocation6 + $0x20] sm:$0xff] }
 0x4e9   :  { %v1084_v20 = vadd.f32 1.0, %v1422_v18  ;;  %1270 = vmatpush.msra.mxu2 %v1243_v17 }
 0x4ea   :  { %1423 = vrcp.f32 %v1064_v19  ;;  %v1076_v10 = vand.u32 2147483648, %v1064_v19  ;;  %v1074_v15 = vand.u32 2147483647, %v1064_v19  ;;  %vm1070_vm3 = vweird.f32 %v1064_v19 }
 0x4eb   :  { %1425 = vrcp.f32 %v1084_v20  ;;  %v1096_v60 = vand.u32 2147483648, %v1084_v20  ;;  %vm1090_vm7 = vweird.f32 %v1084_v20  ;;  %v1094_v26 = vand.u32 2147483647, %v1084_v20 }
 0x4ec   :  { %v1077_v42 = vor.u32 1.1754944e-38, %v1076_v10  ;;  %vm1075_vm5 = vcmp.eq.f32.partialorder %v1074_v15, 8.507059e+37 }
 0x4ed   :  { %v1097_v62 = vor.u32 1.1754944e-38, %v1096_v60  ;;  %vm1095_vm9 = vcmp.eq.f32.partialorder %v1094_v26, 8.507059e+37 }
 0x4f0   :  { %v1424_v21 = vpop.eup %1423 }
 0x4f1   :  { %v1426_v16 = vpop.eup %1425  ;;  %v1066_v22 = vmul.f32 %v1424_v21, %v1064_v19  ;;  %vm1071_vm2 = vweird.f32 %v1424_v21 }
 0x4f2   :  { %v1086_v24 = vmul.f32 %v1426_v16, %v1084_v20  ;;  %vm1072_vm4 = vmor %vm1070_vm3, %vm1071_vm2  ;;  %vm1091_vm6 = vweird.f32 %v1426_v16 }
 0x4f3   :  { %v1067_v23 = vsub.f32 1.0, %v1066_v22  ;;  %vm1092_vm8 = vmor %vm1090_vm7, %vm1091_vm6 }
 0x4f4   :  { %v1087_v38 = vsub.f32 1.0, %v1086_v24  ;;  %v1241_v24 = vld [vmem:[#allocation6 + $0x10] sm:$0xff] }
 0x4f5   :  { %v1068_v63 = vmul.f32 %v1424_v21, %v1067_v23 }
 0x4f6   :  { %v1088_v54 = vmul.f32 %v1426_v16, %v1087_v38 }
 0x4f7   :  { %v1069_v36 = vadd.f32 %v1424_v21, %v1068_v63 }
 0x4f8   :  { %v1089_v56 = vadd.f32 %v1426_v16, %v1088_v54 }
 0x4f9   :  { %v1073_v45 = vsel %vm1072_vm4, %v1424_v21, %v1069_v36  ;;  %v1240_v36 = vld [vmem:[#allocation6 + $0x8] sm:$0xff] }
 0x4fa   :  { %v1078_v49 = vsel %vm1075_vm5, %v1077_v42, %v1073_v45  ;;  %v1093_v27 = vsel %vm1092_vm8, %v1426_v16, %v1089_v56  ;;  %v1242_v16 = vld [vmem:[#allocation6 + $0x18] sm:$0xff]  ;;  %v2475_v42 = vld [vmem:[#allocation40_spill] sm:$0xff] }
 0x4fb   :  { %v1101_v53 = vmul.f32 %v1100_v48, %v1078_v49  ;;  %v1098_v6 = vsel %vm1095_vm9, %v1097_v62, %v1093_v27  ;;  %1271 = vmatpush.msra.mxu2 %v1242_v16  ;;  %v238_v45 = vadd.f32 %v2475_v42, %v2017_v39  ;;  %v1239_v49 = vld [vmem:[#allocation6] sm:$0xff] }
 0x4fd   :  { %v1102_v55 = vadd.f32 %v1101_v53, %v235_v51  ;;  %1272 = vmatpush.msra.mxu2 %v1241_v24 }
 0x4ff   :  { %1427 = vtanh.f32 %v1102_v55  ;;  %1273 = vmatpush.msra.mxu2 %v1240_v36 }
 0x501   :  { %1274 = vmatpush.msra.mxu2 %v1239_v49 }
 0x505   :  { %v1428_v29 = vpop.eup %1427 }
 0x506   :  { %v1104_v44 = vsub.f32 %v993_v59, %v1428_v29 }
 0x508   :  { %v1105_v31 = vmul.f32 %v1104_v44, %v1098_v6 }
 0x50a   :  { %v2369_v28 = vadd.f32 %v1428_v29, %v1105_v31 }
 0x50c   :  { %1129 = vmatmul.f32.vlgmr.msra.gmra.mxu3 %v2369_v28  ;;  %1149 = vmatmul.f32.vlgmr.msra.gmra.mxu0 %v2369_v28 }
 0x50d   :  { %1169 = vmatmul.f32.vlgmr.msra.gmra.mxu1 %v2369_v28 }
 0x589   :  { %v1150_v37 = vpop.f32.mrf.mxu0 }
 0x58a   :  { %v1193_v1 = vadd.f32 %v1150_v37, %v197_v0  ;;  %v1170_v22 = vpop.f32.mrf.mxu1 }
 0x58b   :  { %v1213_v15 = vadd.f32 %v2357_v61, %v1170_v22 }
 0x58c   :  { %v1347_v4 = vmul.f32 -1.442695, %v1193_v1 }
 0x58e   :  { %1429 = vpow2.f32 %v1347_v4 }
 0x58f   :  { %v1130_v5 = vpop.f32.mrf.mxu3 }
 0x590   :  { %v1173_v3 = vadd.f32 %v1130_v5, %v2474_v40 }
 0x592   :  { %v1346_v41 = vmul.f32 -1.442695, %v1173_v3 }
 0x594   :  { %1431 = vpow2.f32 %v1346_v41  ;;  %v1430_v46 = vpop.eup %1429  ;;  %v1358_v41 = vld [vmem:[%s2393_s6] ss:$0 sm:$0xff] }
 0x595   :  { %v1197_v7 = vadd.f32 1.0, %v1430_v46 }
 0x597   :  { %v1209_v54 = vand.u32 2147483648, %v1197_v7  ;;  %vm1203_vm15 = vweird.f32 %v1197_v7  ;;  %v1207_v61 = vand.u32 2147483647, %v1197_v7 }
 0x599   :  { %v1210_v60 = vor.u32 1.1754944e-38, %v1209_v54  ;;  %vm1208_vm1 = vcmp.eq.f32.partialorder %v1207_v61, 8.507059e+37 }
 0x59a   :  { %v1432_v12 = vpop.eup %1431 }
 0x59b   :  { %v1177_v59 = vadd.f32 1.0, %v1432_v12 }
 0x59d   :  { %1433 = vrcp.f32 %v1177_v59  ;;  %v1189_v19 = vand.u32 2147483648, %v1177_v59  ;;  %v1187_v21 = vand.u32 2147483647, %v1177_v59  ;;  %vm1183_vm11 = vweird.f32 %v1177_v59 }
 0x59e   :  { %1435 = vrcp.f32 %v1197_v7 }
 0x59f   :  { %v1190_v63 = vor.u32 1.1754944e-38, %v1189_v19  ;;  %vm1188_vm13 = vcmp.eq.f32.partialorder %v1187_v21, 8.507059e+37 }
 0x5a3   :  { %v1434_v9 = vpop.eup %1433 }
 0x5a4   :  { %v1436_v11 = vpop.eup %1435  ;;  %v1179_v58 = vmul.f32 %v1434_v9, %v1177_v59  ;;  %vm1184_vm10 = vweird.f32 %v1434_v9 }
 0x5a5   :  { %v1199_v18 = vmul.f32 %v1436_v11, %v1197_v7  ;;  %vm1185_vm12 = vmor %vm1183_vm11, %vm1184_vm10  ;;  %vm1204_vm14 = vweird.f32 %v1436_v11 }
 0x5a6   :  { %v1180_v14 = vsub.f32 1.0, %v1179_v58  ;;  %vm1205_vm0 = vmor %vm1203_vm15, %vm1204_vm14 }
 0x5a7   :  { %v1200_v10 = vsub.f32 1.0, %v1199_v18 }
 0x5a8   :  { %v1181_v20 = vmul.f32 %v1434_v9, %v1180_v14 }
 0x5a9   :  { %v1201_v50 = vmul.f32 %v1436_v11, %v1200_v10 }
 0x5aa   :  { %v1182_v23 = vadd.f32 %v1434_v9, %v1181_v20 }
 0x5ab   :  { %v1202_v53 = vadd.f32 %v1436_v11, %v1201_v50 }
 0x5ac   :  { %v1186_v33 = vsel %vm1185_vm12, %v1434_v9, %v1182_v23 }
 0x5ad   :  { %v1191_v38 = vsel %vm1188_vm13, %v1190_v63, %v1186_v33  ;;  %v1206_v55 = vsel %vm1205_vm0, %v1436_v11, %v1202_v53 }
 0x5ae   :  { %v1214_v48 = vmul.f32 %v1213_v15, %v1191_v38  ;;  %v1211_v39 = vsel %vm1208_vm1, %v1210_v60, %v1206_v55 }
 0x5b0   :  { %v1215_v51 = vadd.f32 %v1214_v48, %v238_v45 }
 0x5b2   :  { %1437 = vtanh.f32 %v1215_v51 }
 0x5b8   :  { %v1438_v56 = vpop.eup %1437 }
 0x5b9   :  { %v1217_v26 = vsub.f32 %v2369_v28, %v1438_v56 }
 0x5bb   :  { %v1218_v27 = vmul.f32 %v1217_v26, %v1211_v39 }
 0x5bd   :  { %v1219_v29 = vadd.f32 %v1438_v56, %v1218_v27 }
 0x5bf   :  { %v1348_v62 = vmul.f32 -1.442695, %v1219_v29 }
 0x5c1   :  { %1439 = vpow2.f32 %v1348_v62 }
 0x5c7   :  { %v1440_v44 = vpop.eup %1439 }
 0x5c8   :  { %v1223_v6 = vadd.f32 1.0, %v1440_v44 }
 0x5ca   :  { %1441 = vrcp.f32 %v1223_v6  ;;  %v1235_v37 = vand.u32 2147483648, %v1223_v6  ;;  %v1233_v4 = vand.u32 2147483647, %v1223_v6  ;;  %vm1229_vm3 = vweird.f32 %v1223_v6 }
 0x5cc   :  { %v1236_v40 = vor.u32 1.1754944e-38, %v1235_v37  ;;  %vm1234_vm5 = vcmp.eq.f32.partialorder %v1233_v4, 8.507059e+37 }
 0x5d0   :  { %v1442_v31 = vpop.eup %1441 }
 0x5d1   :  { %v1225_v52 = vmul.f32 %v1442_v31, %v1223_v6  ;;  %vm1230_vm2 = vweird.f32 %v1442_v31 }
 0x5d2   :  { %vm1231_vm4 = vmor %vm1229_vm3, %vm1230_vm2 }
 0x5d3   :  { %v1226_v0 = vsub.f32 1.0, %v1225_v52 }
 0x5d5   :  { %v1227_v1 = vmul.f32 %v1442_v31, %v1226_v0 }
 0x5d7   :  { %v1228_v5 = vadd.f32 %v1442_v31, %v1227_v1 }
 0x5d9   :  { %v1232_v28 = vsel %vm1231_vm4, %v1442_v31, %v1228_v5 }
 0x5da   :  { %v1237_v3 = vsel %vm1234_vm5, %v1236_v40, %v1232_v28 }
 0x5db   :  { %1275 = vmatmul.f32.vlgmr.msra.gmra.mxu2 %v1237_v3 }
 0x65e   :  { %v1276_v43 = vpop.f32.mrf.mxu2 }
 0x65f   :  { %v1277_v47 = vadd.f32 %v1358_v41, %v1276_v43 }
 0x661   :  { %1279 = vst [vmem:[#allocation8] sm:$0xff] %v1277_v47 }
 0x662   :  { %1290 = dma.vmem_to_hbm [thread:$0]  %s1286_s2, 128, %s1288_s16, [#allocation5]  }
 0x663   :  { %1568 = dma.done.wait [#allocation5], 128  }
 0x664   :  { %1569 = vsyncadd [#allocation5], 4294967168 }
 0x665   :  { %1295 = vsyncpa [#allocation4], 1 }
 0x666   :  { %1296 = vsyncpa [#allocation7], 1 }
 0x667   :  { %1297 = vsyncpa [#allocation5], 1 }

</bundles_post_ra>
